<compile_context>
chip_gen: v5e
topology: v5e:2x2
jax: 0.10.0
libtpu: 0.0.40
codegen_flags: <defaults>
</compile_context>

<pallas_src>
import functools

import jax
import jax.numpy as jnp
import numpy as np
from jax.experimental import pallas as pl
from jax.experimental.pallas import tpu as pltpu


def _magnitude(sumsq, spec_power):
    if spec_power == 1:
        return jnp.sqrt(sumsq)
    if spec_power == 2:
        return sumsq
    return jnp.power(sumsq, spec_power / 2.0)


def _make_mono_kernel(spec_power, num_channels):
    inv_c = 1.0 / float(num_channels)

    def kernel(x_ref, spec_ref, phase_ref):
        # x_ref    : (2, C, TB, TF)   planar re/im
        # spec_ref : (TF, TB)         tile of the (F, S, 1, B) output
        # phase_ref: (TB, TF)         tile of the (S, 1, B, F) output
        re = x_ref[0]                               # (C, TB, TF)
        im = x_ref[1]
        mag = _magnitude(re * re + im * im, spec_power)
        ph = jnp.arctan2(im, re)
        mag_m = jnp.sum(mag, axis=0) * inv_c        # channel mean -> (TB, TF)
        ph_m = jnp.sum(ph, axis=0) * inv_c
        phase_ref[...] = ph_m
        # Fold the output permutation into the kernel (XLU transpose of the tile)
        # so the spec output already has the torch (F, ..., B) layout.
        spec_ref[...] = jnp.swapaxes(mag_m, 0, 1)

    return kernel


def _make_multi_kernel(spec_power):
    def kernel(x_ref, spec_ref, phase_ref):
        # x_ref: (2, TB, TF); spec_ref: (TF, TB); phase_ref: (TB, TF)
        re = x_ref[0]
        im = x_ref[1]
        mag = _magnitude(re * re + im * im, spec_power)
        phase_ref[...] = jnp.arctan2(im, re)
        spec_ref[...] = jnp.swapaxes(mag, 0, 1)

    return kernel


def _pick_tiles(c_block, B, F, budget_bytes=24 * 1024 * 1024):
    """Choose (TB, TF): lane-dense (x128) divisors when possible, VMEM-budgeted.

    TB is a lane dim of the spec output and a sublane dim of the input/phase;
    TF is the lane dim of the input/phase.  Both must be multiples of 128 or
    equal to the full extent, so candidates are restricted accordingly.
    """
    tb_cands = [t for t in (512, 384, 256, 128) if B % t == 0] or [B]
    tf_cands = [t for t in (512, 384, 256, 128) if F % t == 0] or [F]

    def step_bytes(tb, tf):
        # interleaved re/im input block + spec + phase tiles, double-buffered.
        return (2 * c_block + 2) * tb * tf * 4 * 2

    for tb in tb_cands:
        for tf in tf_cands:
            if step_bytes(tb, tf) <= budget_bytes:
                return tb, tf
    return tb_cands[-1], tf_cands[-1]


@functools.partial(jax.jit, static_argnames=("spec_power", "mono"))
def spectrogram_pallas(stft_f, *, spec_power=1, mono=True):
    """stft_f: (S, C, B, F, 2) float32.

    Returns (spec, phase) laid out exactly like the torch module:
        spec : (F, S, 1 or C, B)
        phase: (S, 1 or C, B, F)
    """
    S, C, B, F, two = stft_f.shape
    assert two == 2, "last dim must hold (re, im)"

    # Single planar pre-pass (one fused XLA transpose) so the kernel sees
    # contiguous re/im planes; everything downstream is one Pallas pass.
    planar = jnp.moveaxis(stft_f.astype(jnp.float32), -1, 0)   # (2, S, C, B, F)

    TB, TF = _pick_tiles(C if mono else 1, B, F)
    nB, nF = B // TB, F // TF

    if mono:
        grid = (S, nB, nF)
        kernel = _make_mono_kernel(spec_power, C)
        in_specs = [pl.BlockSpec((2, None, C, TB, TF),
                                 lambda s, bi, fi: (0, s, 0, bi, fi))]
        out_specs = [
            # spec: (F, S, 1, B) written directly in final layout
            pl.BlockSpec((TF, None, None, TB), lambda s, bi, fi: (fi, s, 0, bi)),
            # phase: (S, 1, B, F)
            pl.BlockSpec((None, None, TB, TF), lambda s, bi, fi: (s, 0, bi, fi)),
        ]
        out_shape = (jax.ShapeDtypeStruct((F, S, 1, B), jnp.float32),
                     jax.ShapeDtypeStruct((S, 1, B, F), jnp.float32))
        dims = ("parallel", "parallel", "parallel")
    else:
        grid = (S, C, nB, nF)
        kernel = _make_multi_kernel(spec_power)
        in_specs = [pl.BlockSpec((2, None, None, TB, TF),
                                 lambda s, c, bi, fi: (0, s, c, bi, fi))]
        out_specs = [
            pl.BlockSpec((TF, None, None, TB), lambda s, c, bi, fi: (fi, s, c, bi)),
            pl.BlockSpec((None, None, TB, TF), lambda s, c, bi, fi: (s, c, bi, fi)),
        ]
        out_shape = (jax.ShapeDtypeStruct((F, S, C, B), jnp.float32),
                     jax.ShapeDtypeStruct((S, C, B, F), jnp.float32))
        dims = ("parallel", "parallel", "parallel", "parallel")

    spec, phase = pl.pallas_call(
        kernel,
        grid=grid,
        in_specs=in_specs,
        out_specs=out_specs,
        out_shape=out_shape,
        compiler_params=pltpu.CompilerParams(
            dimension_semantics=dims,
            vmem_limit_bytes=40 * 1024 * 1024,
        ),
    )(planar)
    return spec, phase


def _reference(stft_f, spec_power=1, mono=True):
    """Pure-jnp reference mirroring the PyTorch forward."""
    phase = jnp.arctan2(stft_f[..., 1], stft_f[..., 0])          # (S,C,B,F)
    x = jnp.swapaxes(stft_f, 2, 3)                               # (S,C,F,B,2)
    x = jnp.power(jnp.sum(x ** 2, axis=-1), spec_power / 2.0)    # (S,C,F,B)
    if mono:
        x = jnp.mean(x, axis=1, keepdims=True)
        phase = jnp.mean(phase, axis=1, keepdims=True)
    return jnp.transpose(x, (2, 0, 1, 3)), phase


if __name__ == "__main__":
    key = jax.random.PRNGKey(0)
    # Small but lane-dense shapes consistent with the module (stereo STFT).
    S, C, B, F = 2, 2, 16, 128
    stft_f = jax.random.normal(key, (S, C, B, F, 2), dtype=jnp.float32)

    # Module defaults: magnitude spectrogram, mono downmix.
    spec, phase = spectrogram_pallas(stft_f, spec_power=1, mono=True)
    spec = jax.block_until_ready(spec)
    phase = jax.block_until_ready(phase)
    spec_r, phase_r = _reference(stft_f, 1, True)
    assert spec.shape == (F, S, 1, B), spec.shape
    assert phase.shape == (S, 1, B, F), phase.shape
    np.testing.assert_allclose(np.asarray(spec), np.asarray(spec_r),
                               rtol=1e-5, atol=1e-5)
    np.testing.assert_allclose(np.asarray(phase), np.asarray(phase_r),
                               rtol=1e-5, atol=1e-5)

    # Power spectrogram, per-channel (non-mono) path.
    spec2, phase2 = spectrogram_pallas(stft_f, spec_power=2, mono=False)
    spec2 = jax.block_until_ready(spec2)
    phase2 = jax.block_until_ready(phase2)
    spec2_r, phase2_r = _reference(stft_f, 2, False)
    assert spec2.shape == (F, S, C, B), spec2.shape
    assert phase2.shape == (S, C, B, F), phase2.shape
    np.testing.assert_allclose(np.asarray(spec2), np.asarray(spec2_r),
                               rtol=1e-5, atol=1e-5)
    np.testing.assert_allclose(np.asarray(phase2), np.asarray(phase2_r),
                               rtol=1e-5, atol=1e-5)

    print("KERNEL_OK")
</pallas_src>

<mosaic_0001>
module attributes {stable_mosaic.version = 11 : i64} {
  func.func @kernel(%arg0: i32, %arg1: i32, %arg2: i32, %arg3: memref<2x1x2x16x128xf32, #tpu.memory_space<vmem>>, %arg4: memref<128x1x1x16xf32, #tpu.memory_space<vmem>>, %arg5: memref<1x1x16x128xf32, #tpu.memory_space<vmem>>) attributes {dimension_semantics = [#tpu.dimension_semantics<parallel>, #tpu.dimension_semantics<parallel>, #tpu.dimension_semantics<parallel>], iteration_bounds = array<i64: 2, 1, 1>, scalar_prefetch = 0 : i64, scratch_operands = 0 : i64, tpu.core_type = #tpu.core_type<tc>, window_params = [{transform_indices = @transform_0, window_bounds = array<i64: 2, 1, 2, 16, 128>}, {transform_indices = @transform_1, window_bounds = array<i64: 128, 1, 1, 16>}, {transform_indices = @transform_2, window_bounds = array<i64: 1, 1, 16, 128>}]} {
    %c0 = arith.constant 0 : index
    %c0_0 = arith.constant 0 : index
    %c0_1 = arith.constant 0 : index
    %c0_2 = arith.constant 0 : index
    %c0_3 = arith.constant 0 : index
    %0 = vector.load %arg3[%c0, %c0_0, %c0_1, %c0_2, %c0_3] : memref<2x1x2x16x128xf32, #tpu.memory_space<vmem>>, vector<1x1x2x16x128xf32>
    %1 = vector.shape_cast %0 : vector<1x1x2x16x128xf32> to vector<2x16x128xf32>
    %c1 = arith.constant 1 : index
    %c0_4 = arith.constant 0 : index
    %c0_5 = arith.constant 0 : index
    %c0_6 = arith.constant 0 : index
    %c0_7 = arith.constant 0 : index
    %2 = vector.load %arg3[%c1, %c0_4, %c0_5, %c0_6, %c0_7] : memref<2x1x2x16x128xf32, #tpu.memory_space<vmem>>, vector<1x1x2x16x128xf32>
    %3 = vector.shape_cast %2 : vector<1x1x2x16x128xf32> to vector<2x16x128xf32>
    %4 = arith.mulf %1, %1 : vector<2x16x128xf32>
    %5 = arith.mulf %3, %3 : vector<2x16x128xf32>
    %6 = arith.addf %4, %5 : vector<2x16x128xf32>
    %7 = math.sqrt %6 : vector<2x16x128xf32>
    %8 = math.atan2 %3, %1 : vector<2x16x128xf32>
    %cst = arith.constant dense<0.000000e+00> : vector<16x128xf32>
    %9 = vector.multi_reduction <add>, %7, %cst [0] : vector<2x16x128xf32> to vector<16x128xf32>
    %cst_8 = arith.constant 5.000000e-01 : f32
    %10 = vector.broadcast %cst_8 : f32 to vector<16x128xf32>
    %11 = arith.mulf %9, %10 : vector<16x128xf32>
    %cst_9 = arith.constant dense<0.000000e+00> : vector<16x128xf32>
    %12 = vector.multi_reduction <add>, %8, %cst_9 [0] : vector<2x16x128xf32> to vector<16x128xf32>
    %cst_10 = arith.constant 5.000000e-01 : f32
    %13 = vector.broadcast %cst_10 : f32 to vector<16x128xf32>
    %14 = arith.mulf %12, %13 : vector<16x128xf32>
    %c0_11 = arith.constant 0 : index
    %c0_12 = arith.constant 0 : index
    %c0_13 = arith.constant 0 : index
    %c0_14 = arith.constant 0 : index
    %15 = vector.load %arg5[%c0_11, %c0_12, %c0_13, %c0_14] : memref<1x1x16x128xf32, #tpu.memory_space<vmem>>, vector<1x1x16x128xf32>
    %16 = vector.shape_cast %15 : vector<1x1x16x128xf32> to vector<16x128xf32>
    %17 = vector.shape_cast %14 : vector<16x128xf32> to vector<1x1x16x128xf32>
    tpu.vector_store %arg5[%c0_11, %c0_12, %c0_13, %c0_14], %17 {strides = array<i32>} : memref<1x1x16x128xf32, #tpu.memory_space<vmem>>, vector<1x1x16x128xf32>,
    %18 = tpu.transpose %11, [1, 0] : vector<16x128xf32> -> vector<128x16xf32>
    %c0_15 = arith.constant 0 : index
    %c0_16 = arith.constant 0 : index
    %c0_17 = arith.constant 0 : index
    %c0_18 = arith.constant 0 : index
    %19 = vector.load %arg4[%c0_15, %c0_16, %c0_17, %c0_18] : memref<128x1x1x16xf32, #tpu.memory_space<vmem>>, vector<128x1x1x16xf32>
    %20 = vector.shape_cast %19 : vector<128x1x1x16xf32> to vector<128x16xf32>
    %21 = vector.shape_cast %18 : vector<128x16xf32> to vector<128x1x1x16xf32>
    tpu.vector_store %arg4[%c0_15, %c0_16, %c0_17, %c0_18], %21 {strides = array<i32>} : memref<128x1x1x16xf32, #tpu.memory_space<vmem>>, vector<128x1x1x16xf32>,
    return
  }
  func.func @transform_0(%arg0: i32, %arg1: i32, %arg2: i32) -> (i32, i32, i32, i32, i32) {
    %c0_i32 = arith.constant 0 : i32
    %c0_i32_0 = arith.constant 0 : i32
    %c0_i32_1 = arith.constant 0 : i32
    return %c0_i32, %arg0, %c0_i32_0, %arg1, %arg2 : i32, i32, i32, i32, i32
  }
  func.func @transform_1(%arg0: i32, %arg1: i32, %arg2: i32) -> (i32, i32, i32, i32) {
    %c0_i32 = arith.constant 0 : i32
    %c0_i32_0 = arith.constant 0 : i32
    return %arg2, %arg0, %c0_i32, %arg1 : i32, i32, i32, i32
  }
  func.func @transform_2(%arg0: i32, %arg1: i32, %arg2: i32) -> (i32, i32, i32, i32) {
    %c0_i32 = arith.constant 0 : i32
    %c0_i32_0 = arith.constant 0 : i32
    return %arg0, %c0_i32, %arg1, %arg2 : i32, i32, i32, i32
  }
}

</mosaic_0001>

<bundles_post_ra>
// kernel: spectrogram_pallas.1
= control target key start
LH: loop header
LB: loop body
LE: loop exit
PB: predicated region body
PF: predicated region fallthrough
CT: control target
= control target key end

     0   :  { %8 = vsyncpa [#allocation5], 0  ;;  %s2714_s0 = inlined_call_operand.vmem [shape: f32[2,2,2,16,128], index: 0, kind: input, shape index: {}]   ;;  %s2715_s1 = inlined_call_operand.vmem [shape: f32[128,2,1,16], index: 1, kind: output, shape index: {0}]   ;;  %s2716_s2 = inlined_call_operand.hbm [shape: f32[2,1,16,128], index: 2, kind: output, shape index: {1}]  }
   0x1   :  { %10 = vsyncpa [#allocation5 + $0x1], 0  ;;  %s1864_s9 = smov 0   ;;  %s1866_s10 = smov 0  }
   0x2   :  { %s1868_s11 = smov 0   ;;  %s1870_s12 = smov 0  }
   0x3   :  { %s1872_s13 = smov 0   ;;  %s1874_s14 = smov 0  }
   0x4 LB: > { %s1667_s15 = sadd.s32 4294967295, %s1843_s14   ;;  %s1668_s16 = sadd.s32 4294967294, %s1843_s14   ;;  %s1843_s14 = sphi %s1874_s14, %s16_s14   ;;  %s1839_s13 = sphi %s1872_s13, %s2735_s13   ;;  %s1835_s12 = sphi %s1870_s12, %s2734_s12   ;;  %s1831_s11 = sphi %s1868_s11, %s2733_s11   ;;  %s1827_s10 = sphi %s1866_s10, %s2732_s10   ;;  %s1823_s9 = sphi %s1864_s9, %s2731_s9  }
   0x5   : > { %s35_s17 = sadd.s32 1, %s1839_s13  ;;  %s46_s18 = sadd.s32 1, %s1831_s11 }
   0x6   : > { %p37_p0 = scmp.ge.s32.totalorder %s35_s17, 2  ;;  %p53_p1 = scmp.ne.s32.totalorder %s1831_s11, %s1827_s10 }
   0x7   : > { %p54_p2 = scmp.eq.s32.totalorder %s1843_s14, 0  ;;  %p87_p3 = scmp.eq.s32.totalorder %s1667_s15, 1 }
   0x8   : > { %s2737_s17 = smov (%p37_p0, %s35_s17), 0  ;;  %p122_p6 = scmp.ne.s32.totalorder %s1827_s10, %s1823_s9 }
   0x9   : > { %p55_p4 = por %p54_p2, %p53_p1  ;;  %p1903_p5 = por %p87_p3, %p53_p1 }
   0xa   : > { %s39_s20 = ssub.s32 %s1839_s13, %s2737_s17  ;;  %p123_p8 = scmp.eq.s32.totalorder %s1668_s16, 1 }
   0xb   : > { %p44_p7 = scmp.eq.s32.totalorder %s39_s20, 0  ;;  %p1670_p10 = scmp.ge.s32.totalorder %s1843_s14, 2 }
   0xc   : > { %p1914_p9 = por %p123_p8, %p122_p6 }
   0xd   : > { %s1912_s21 = scalar_select %p44_p7, %s1831_s11, %s46_s18  }
   0xe   : > { %139 = sbr.rel (%p1670_p10) target bundleno = 31 (0x1f), region = 16 }
  0x13   : > { %142 = sbr.rel (!%p55_p4) target bundleno = 31 (0x1f), region = 20  ;;  %s144_s23 = sand.u32 (%p55_p4), 1, %s1831_s11  }
  0x14   : > { %s1688_s24 = sshll.u32 (%p55_p4), %s1839_s13, 5  ;;  %s1671_s25 = sshll.u32 (%p55_p4), %s144_s23, 6 }
  0x15   : > { %s152_s28 = scalar_lea.vmem (%p55_p4), %s2714_s0, %s1688_s24  ;;  %s146_s29 = scalar_lea.vmem (%p55_p4), [#allocation2], %s1671_s25 }
  0x16   : > { %v195_v0 = vld [vmem:[%s152_s28] sm:$0xff] (%p55_p4)  ;;  %v197_v1 = vld [vmem:[%s152_s28 + $0x8] sm:$0xff] (%p55_p4)  ;;  %v199_v2 = vld [vmem:[%s152_s28 + $0x10] sm:$0xff] (%p55_p4) }
  0x17   : > { %196 = vst [vmem:[%s146_s29] sm:$0xff] (%p55_p4), %v195_v0  ;;  %v201_v3 = vld [vmem:[%s152_s28 + $0x18] sm:$0xff] (%p55_p4)  ;;  %v203_v4 = vld [vmem:[%s152_s28 + $0x40] sm:$0xff] (%p55_p4)  ;;  %v205_v5 = vld [vmem:[%s152_s28 + $0x48] sm:$0xff] (%p55_p4) }
  0x18   : > { %198 = vst [vmem:[%s146_s29 + $0x8] sm:$0xff] %v197_v1  ;;  %v207_v6 = vld [vmem:[%s152_s28 + $0x50] sm:$0xff]  ;;  %v209_v7 = vld [vmem:[%s152_s28 + $0x58] sm:$0xff] }
  0x19   : > { %200 = vst [vmem:[%s146_s29 + $0x10] sm:$0xff] %v199_v2 }
  0x1a   : > { %202 = vst [vmem:[%s146_s29 + $0x18] sm:$0xff] %v201_v3 }
  0x1b   : > { %204 = vst [vmem:[%s146_s29 + $0x20] sm:$0xff] %v203_v4 }
  0x1c   : > { %206 = vst [vmem:[%s146_s29 + $0x28] sm:$0xff] %v205_v5 }
  0x1d   : > { %208 = vst [vmem:[%s146_s29 + $0x30] sm:$0xff] %v207_v6 }
  0x1e   : > { %210 = vst [vmem:[%s146_s29 + $0x38] sm:$0xff] %v209_v7 }
  0x1f PF: > { %p1674_p11 = scmp.ge.s32.totalorder %s1843_s14, 1  ;;  %p215_p12 = scmp.lt.s32.totalorder %s1843_s14, 3 }
  0x21   : > { %p216_p13 = pnand %p1674_p11, %p215_p12 }
  0x22   : > { %s1929_s30 = sand.u32 (!%p216_p13), 1, %s1827_s10  }
  0x23   : > { %219 = sbr.rel (%p216_p13) target bundleno = 510 (0x1fe), region = 58  ;;  %s1675_s3 = sshll.u32 (!%p216_p13), %s1929_s30, 6 }
  0x24   : > { %s224_s4 = scalar_lea.vmem (!%p216_p13), [#allocation2], %s1675_s3  ;;  %s1677_s5 = sshll.u32 (!%p216_p13), %s1929_s30, 4 }
  0x25   : > { %s2096_s6 = scalar_lea.vmem (!%p216_p13), [#allocation4], %s1677_s5  ;;  %s1676_s7 = sshll.u32 (!%p216_p13), %s1929_s30, 7 }
  0x26   : > { %s2150_s8 = scalar_lea.vmem (!%p216_p13), [#allocation3], %s1676_s7  ;;  %s975_s15 = scalar_lea.sflag (!%p216_p13), [#allocation5], %s1929_s30 }
  0x28   : > { %v1932_v8 = vld [vmem:[%s224_s4] sm:$0xff]  ;;  %v1934_v9 = vld [vmem:[%s224_s4 + $0x10] sm:$0xff]  ;;  %v1949_v16 = vld [vmem:[%s224_s4 + $0x8] sm:$0xff]  ;;  %s2416_s20 = scalar_lea.vmem (%p1903_p5), %s2715_s1, %s1835_s12 }
  0x29   : > { %v1936_v10 = vld [vmem:[%s224_s4 + $0x20] sm:$0xff]  ;;  %v1938_v11 = vld [vmem:[%s224_s4 + $0x30] sm:$0xff]  ;;  %v259_v12 = vmul.f32 %v1932_v8, %v1932_v8  ;;  %v261_v13 = vmul.f32 %v1934_v9, %v1934_v9  ;;  %v1947_v15 = vand.u32 2147483647, %v1932_v8  ;;  %v1951_v17 = vld [vmem:[%s224_s4 + $0x18] sm:$0xff]  ;;  %v260_v23 = vmul.f32 %v1949_v16, %v1949_v16 }
  0x2a   : > { %v263_v14 = vmul.f32 %v1936_v10, %v1936_v10  ;;  %v265_v18 = vmul.f32 %v1938_v11, %v1938_v11  ;;  %v1956_v19 = vand.u32 2147483647, %v1936_v10  ;;  %v1958_v20 = vld [vmem:[%s224_s4 + $0x28] sm:$0xff]  ;;  %v1960_v21 = vld [vmem:[%s224_s4 + $0x38] sm:$0xff]  ;;  %v262_v24 = vmul.f32 %v1951_v17, %v1951_v17 }
  0x2b   : > { %v264_v27 = vmul.f32 %v1958_v20, %v1958_v20  ;;  %v266_v28 = vmul.f32 %v1960_v21, %v1960_v21  ;;  %vm366_vm12 = vcmp.ne.f32.partialorder %v1932_v8, %v1932_v8  ;;  %vm367_vm13 = vcmp.ne.f32.partialorder %v1936_v10, %v1936_v10 }
  0x2c   : > { %v1962_v22 = vadd.f32 %v263_v14, %v259_v12  ;;  %v1968_v25 = vadd.f32 %v265_v18, %v261_v13  ;;  %v322_v26 = vmax.f32 %v1947_v15, %v1956_v19  ;;  %v321_v46 = vmin.f32 %v1947_v15, %v1956_v19  ;;  %vm2031_vm14 = vmor %vm366_vm12, %vm367_vm13 }
  0x2d   : > { %v1978_v29 = vadd.f32 %v264_v27, %v260_v23  ;;  %v1980_v30 = vadd.f32 %v266_v28, %v262_v24  ;;  %vm372_vm15 = vcmp.eq.s32.totalorder %v1947_v15, inf }
  0x2e   : > { %1749 = vrsqrt.f32 %v1962_v22  ;;  %vm328_vm0 = vweird.f32 %v322_v26  ;;  %v334_v39 = vand.u32 2147483648, %v322_v26  ;;  %v332_v43 = vand.u32 2147483647, %v322_v26 }
  0x2f   : > { %1751 = vrsqrt.f32 %v1968_v25  ;;  %vm278_vm2 = vcmp.eq.f32.partialorder %v1962_v22, inf  ;;  %vm280_vm3 = vcmp.eq.f32.partialorder %v1962_v22, 0.0  ;;  %v281_v58 = vand.u32 2147483648, %v1962_v22 }
  0x30   : > { %1753 = vrcp.f32 %v322_v26  ;;  %v335_v53 = vor.u32 1.1754944e-38, %v334_v39  ;;  %vm333_vm5 = vcmp.eq.f32.partialorder %v332_v43, 8.507059e+37  ;;  %vm302_vm6 = vcmp.eq.f32.partialorder %v1968_v25, inf }
  0x31   : > { %1755 = vrsqrt.f32 %v1978_v29  ;;  %v305_v62 = vand.u32 2147483648, %v1968_v25  ;;  %vm304_vm7 = vcmp.eq.f32.partialorder %v1968_v25, 0.0  ;;  %vm290_vm8 = vcmp.eq.f32.partialorder %v1978_v29, inf }
  0x32   : > { %1757 = vrsqrt.f32 %v1980_v30  ;;  %vm292_vm9 = vcmp.eq.f32.partialorder %v1978_v29, 0.0  ;;  %v293_v23 = vand.u32 2147483648, %v1978_v29  ;;  %vm314_vm10 = vcmp.eq.f32.partialorder %v1980_v30, inf }
  0x33   : > { %vm316_vm11 = vcmp.eq.f32.partialorder %v1980_v30, 0.0 }
  0x34   : > { %v1750_v31 = vpop.eup %1749 }
  0x35   : > { %v1752_v32 = vpop.eup %1751  ;;  %v272_v33 = vmul.f32 %v1750_v31, %v1962_v22 }
  0x36   : > { %v1754_v34 = vpop.eup %1753  ;;  %v296_v35 = vmul.f32 %v1752_v32, %v1968_v25 }
  0x37   : > { %v273_v36 = vmul.f32 %v1750_v31, %v272_v33  ;;  %v324_v37 = vmul.f32 %v1754_v34, %v322_v26  ;;  %v1756_v40 = vpop.eup %1755  ;;  %vm329_vm1 = vweird.f32 %v1754_v34 }
  0x38   : > { %v297_v38 = vmul.f32 %v1752_v32, %v296_v35  ;;  %v1758_v44 = vpop.eup %1757  ;;  %v284_v47 = vmul.f32 %v1756_v40, %v1978_v29  ;;  %vm1993_vm4 = vmor %vm328_vm0, %vm329_vm1  ;;  %vm373_vm0 = vcmp.eq.s32.totalorder %v1956_v19, inf }
  0x39   : > { %v274_v41 = vmul.f32 0.5, %v273_v36  ;;  %v325_v42 = vsub.f32 1.0, %v324_v37  ;;  %v308_v50 = vmul.f32 %v1758_v44, %v1980_v30  ;;  %vm2037_vm1 = vmand %vm372_vm15, %vm373_vm0  ;;  %vm482_vm0 = vcmp.lt.s32.totalorder %v1934_v9, 0 }
  0x3a   : > { %v298_v45 = vmul.f32 0.5, %v297_v38  ;;  %v285_v54 = vmul.f32 %v1756_v40, %v284_v47 }
  0x3b   : > { %v275_v48 = vsub.f32 1.5, %v274_v41  ;;  %v326_v49 = vmul.f32 %v1754_v34, %v325_v42  ;;  %v309_v57 = vmul.f32 %v1758_v44, %v308_v50 }
  0x3c   : > { %v299_v51 = vsub.f32 1.5, %v298_v45  ;;  %v286_v60 = vmul.f32 0.5, %v285_v54  ;;  %v2045_v45 = vand.u32 2147483647, %v1938_v11 }
  0x3d   : > { %v276_v55 = vmul.f32 %v1750_v31, %v275_v48  ;;  %v327_v56 = vadd.f32 %v1754_v34, %v326_v49  ;;  %v310_v0 = vmul.f32 0.5, %v309_v57 }
  0x3e   : > { %v300_v59 = vmul.f32 %v1752_v32, %v299_v51  ;;  %v287_v3 = vsub.f32 1.5, %v286_v60 }
  0x3f   : > { %v277_v61 = vmul.f32 %v276_v55, %v1962_v22  ;;  %v331_v63 = vsel %vm1993_vm4, %v1754_v34, %v327_v56  ;;  %v311_v6 = vsub.f32 1.5, %v310_v0 }
  0x40   : > { %v301_v1 = vmul.f32 %v300_v59, %v1968_v25  ;;  %v336_v2 = vsel %vm333_vm5, %v335_v53, %v331_v63  ;;  %v288_v13 = vmul.f32 %v1756_v40, %v287_v3 }
  0x41   : > { %v279_v4 = vsel %vm278_vm2, %v1962_v22, %v277_v61  ;;  %v2008_v5 = vmul.f32 %v336_v2, %v321_v46  ;;  %v312_v24 = vmul.f32 %v1758_v44, %v311_v6  ;;  %v317_v22 = vand.u32 2147483648, %v1980_v30 }
  0x42   : > { %v282_v7 = vsel %vm280_vm3, %v281_v58, %v279_v4  ;;  %v303_v12 = vsel %vm302_vm6, %v1968_v25, %v301_v1  ;;  %v289_v27 = vmul.f32 %v288_v13, %v1978_v29  ;;  %v2042_v44 = vand.u32 2147483647, %v1934_v9 }
  0x43   : > { %v306_v14 = vsel %vm304_vm7, %v305_v62, %v303_v12  ;;  %v338_v18 = vmul.f32 %v2008_v5, %v2008_v5  ;;  %v313_v25 = vmul.f32 %v312_v24, %v1980_v30  ;;  %vm356_vm6 = vcmp.gt.f32.partialorder %v1956_v19, %v1947_v15 }
  0x44   : > { %v559_v26 = vadd.f32 %v306_v14, %v282_v7  ;;  %v291_v32 = vsel %vm290_vm8, %v1978_v29, %v289_v27  ;;  %v442_v47 = vmax.f32 %v2042_v44, %v2045_v45  ;;  %v441_v63 = vmin.f32 %v2042_v44, %v2045_v45 }
  0x45   : > { %v339_v28 = vmul.f32 0.002785687, %v338_v18  ;;  %v294_v34 = vsel %vm292_vm9, %v293_v23, %v291_v32  ;;  %v315_v35 = vsel %vm314_vm10, %v1980_v30, %v313_v25  ;;  %vm362_vm7 = vcmp.lt.s32.totalorder %v1932_v8, 0 }
  0x46   : > { %v561_v31 = vmul.f32 0.5, %v559_v26  ;;  %v318_v36 = vsel %vm316_vm11, %v317_v22, %v315_v35  ;;  %1759 = vrcp.f32 %v442_v47  ;;  %vm448_vm2 = vweird.f32 %v442_v47 }
  0x47   : > { %v340_v33 = vadd.f32 -0.015866, %v339_v28  ;;  %v560_v38 = vadd.f32 %v318_v36, %v294_v34  ;;  %v454_v55 = vand.u32 2147483648, %v442_v47  ;;  %v452_v58 = vand.u32 2147483647, %v442_v47 }
  0x48   : > { %569 = vxpose.xlu0.b32.start [1/2] (short) %v561_v31, 128  ;;  %vm359_vm8 = vcmp.lt.f32.partialorder %v1932_v8, 0.0  ;;  %v1845_v14 = vmov 0.0   ;;  %vm364_vm9 = vcmp.eq.f32.partialorder %v1936_v10, 0.0  ;;  %v1846_v24 = vmov 0.7853982  }
  0x49   : > { %v341_v37 = vmul.f32 %v340_v33, %v338_v18  ;;  %v562_v40 = vmul.f32 0.5, %v560_v38  ;;  %v455_v61 = vor.u32 1.1754944e-38, %v454_v55  ;;  %vm453_vm5 = vcmp.eq.f32.partialorder %v452_v58, 8.507059e+37 }
  0x4a   : > { %v371_v15 = vsel %vm359_vm8, 2.3561945, %v1846_v24  ;;  %v377_v22 = vand.u32 2147483648, %v1936_v10  ;;  %vm492_vm10 = vcmp.eq.s32.totalorder %v2042_v44, inf  ;;  %vm493_vm11 = vcmp.eq.s32.totalorder %v2045_v45, inf }
  0x4b   : > { %v342_v39 = vadd.f32 0.04247222, %v341_v37  ;;  %vm2067_vm12 = vmand %vm492_vm10, %vm493_vm11  ;;  %vm476_vm15 = vcmp.gt.f32.partialorder %v2045_v45, %v2042_v44  ;;  %v483_v45 = vsel %vm482_vm0, 3.1415927, %v1845_v14 }
  0x4c   : > { %v1760_v52 = vpop.eup %1759 }
  0x4d   : > { %v343_v41 = vmul.f32 %v342_v39, %v338_v18  ;;  %v444_v54 = vmul.f32 %v1760_v52, %v442_v47  ;;  %vm449_vm3 = vweird.f32 %v1760_v52  ;;  %v2072_v39 = vand.u32 2147483647, %v1949_v16 }
  0x4e   : > { %vm450_vm4 = vmor %vm448_vm2, %vm449_vm3  ;;  %vm486_vm2 = vcmp.ne.f32.partialorder %v1934_v9, %v1934_v9  ;;  %vm487_vm3 = vcmp.ne.f32.partialorder %v1938_v11, %v1938_v11 }
  0x4f   : > { %v344_v29 = vadd.f32 -0.074975304, %v343_v41  ;;  %v445_v57 = vsub.f32 1.0, %v444_v54 }
  0x50   : > { %570 = vxpose.xlu0.b32.end [2/2] (short) %v562_v40, 128  ;;  %v2075_v40 = vand.u32 2147483647, %v1958_v20 }
  0x51   : > { %v345_v43 = vmul.f32 %v344_v29, %v338_v18  ;;  %v446_v60 = vmul.f32 %v1760_v52, %v445_v57 }
  0x52   : > { %v382_v42 = vmax.f32 %v2072_v39, %v2075_v40  ;;  %v381_v58 = vmin.f32 %v2072_v39, %v2075_v40 }
  0x53   : > { %v346_v46 = vadd.f32 0.1064488, %v345_v43  ;;  %v447_v0 = vadd.f32 %v1760_v52, %v446_v60 }
  0x54   : > { %1761 = vrcp.f32 %v382_v42  ;;  %vm388_vm13 = vweird.f32 %v382_v42 }
  0x55   : > { %v347_v48 = vmul.f32 %v346_v46, %v338_v18  ;;  %v451_v2 = vsel %vm450_vm4, %v1760_v52, %v447_v0 }
  0x56   : > { %v456_v3 = vsel %vm453_vm5, %v455_v61, %v451_v2  ;;  %v497_v2 = vand.u32 2147483648, %v1938_v11 }
  0x57   : > { %v348_v49 = vadd.f32 -0.14207031, %v347_v48  ;;  %v457_v6 = vmul.f32 %v456_v3, %v441_v63 }
  0x59   : > { %v349_v50 = vmul.f32 %v348_v49, %v338_v18  ;;  %v458_v12 = vmul.f32 %v457_v6, %v457_v6 }
  0x5a   : > { %v1762_v47 = vpop.eup %1761 }
  0x5b   : > { %v350_v51 = vadd.f32 0.19993454, %v349_v50  ;;  %v384_v49 = vmul.f32 %v1762_v47, %v382_v42  ;;  %v394_v50 = vand.u32 2147483648, %v382_v42 }
  0x5d   : > { %v351_v53 = vmul.f32 %v350_v51, %v338_v18  ;;  %v385_v52 = vsub.f32 1.0, %v384_v49 }
  0x5f   : > { %v352_v56 = vadd.f32 -0.33333147, %v351_v53  ;;  %v392_v53 = vand.u32 2147483647, %v382_v42  ;;  %v386_v55 = vmul.f32 %v1762_v47, %v385_v52 }
  0x61   : > { %v353_v59 = vmul.f32 %v352_v56, %v338_v18  ;;  %v363_v18 = vsel %vm362_vm7, 3.1415927, %v1845_v14  ;;  %v395_v56 = vor.u32 1.1754944e-38, %v394_v50  ;;  %vm393_vm5 = vcmp.eq.f32.partialorder %v392_v53, 8.507059e+37  ;;  %vm488_vm7 = vmor %vm486_vm2, %vm487_vm3 }
  0x62   : > { %vm416_vm2 = vcmp.gt.f32.partialorder %v2075_v40, %v2072_v39  ;;  %vm419_vm3 = vcmp.lt.f32.partialorder %v1949_v16, 0.0 }
  0x63   : > { %v354_v62 = vmul.f32 %v353_v59, %v2008_v5  ;;  %v387_v59 = vadd.f32 %v1762_v47, %v386_v55 }
  0x65   : > { %v355_v1 = vadd.f32 %v354_v62, %v2008_v5  ;;  %v459_v5 = vmul.f32 0.002785687, %v458_v12 }
  0x67   : > { %v357_v4 = vsub.f32 1.5707964, %v355_v1  ;;  %v460_v26 = vadd.f32 -0.015866, %v459_v5 }
  0x69   : > { %v358_v7 = vsel %vm356_vm6, %v357_v4, %v355_v1  ;;  %v461_v28 = vmul.f32 %v460_v26, %v458_v12  ;;  %vm484_vm6 = vcmp.eq.f32.partialorder %v1938_v11, 0.0  ;;  %v557_v26 = vand.u32 2147483648, %v1960_v21 }
  0x6a   : > { %v360_v13 = vsub.f32 3.1415927, %v358_v7 }
  0x6b   : > { %v462_v31 = vadd.f32 0.04247222, %v461_v28 }
  0x6c   : > { %v361_v23 = vsel %vm359_vm8, %v360_v13, %v358_v7  ;;  %vm432_vm8 = vcmp.eq.s32.totalorder %v2072_v39, inf }
  0x6d   : > { %v365_v19 = vsel %vm364_vm9, %v363_v18, %v361_v23  ;;  %v463_v33 = vmul.f32 %v462_v31, %v458_v12  ;;  %vm433_vm9 = vcmp.eq.s32.totalorder %v2075_v40, inf }
  0x6e   : > { %v369_v27 = vsel %vm2031_vm14, nan, %v365_v19  ;;  %vm389_vm14 = vweird.f32 %v1762_v47  ;;  %vm2101_vm10 = vmand %vm432_vm8, %vm433_vm9 }
  0x6f   : > { %v375_v8 = vsel %vm2037_vm1, %v371_v15, %v369_v27  ;;  %v464_v34 = vadd.f32 -0.074975304, %v463_v33  ;;  %vm479_vm1 = vcmp.lt.f32.partialorder %v1934_v9, 0.0  ;;  %vm390_vm4 = vmor %vm388_vm13, %vm389_vm14 }
  0x70   : > { %v376_v25 = vand.u32 2147483647, %v375_v8  ;;  %v391_v60 = vsel %vm390_vm4, %v1762_v47, %v387_v59  ;;  %v491_v61 = vsel %vm479_vm1, 2.3561945, %v1846_v24  ;;  %v2109_v8 = vand.u32 2147483647, %v1960_v21 }
  0x71   : > { %v465_v36 = vmul.f32 %v464_v34, %v458_v12  ;;  %v396_v62 = vsel %vm393_vm5, %v395_v56, %v391_v60  ;;  %vm422_vm4 = vcmp.lt.s32.totalorder %v1949_v16, 0  ;;  %vm424_vm5 = vcmp.eq.f32.partialorder %v1958_v20, 0.0 }
  0x72   : > { %v378_v32 = vor.u32 %v377_v22, %v376_v25  ;;  %v397_v0 = vmul.f32 %v396_v62, %v381_v58  ;;  %v2106_v22 = vand.u32 2147483647, %v1951_v17  ;;  %vm553_vm0 = vcmp.eq.s32.totalorder %v2109_v8, inf }
  0x73   : > { %v466_v37 = vadd.f32 0.1064488, %v465_v36 }
  0x74   : > { %v398_v4 = vmul.f32 %v397_v0, %v397_v0  ;;  %v502_v25 = vmax.f32 %v2106_v22, %v2109_v8  ;;  %vm536_vm9 = vcmp.gt.f32.partialorder %v2109_v8, %v2106_v22 }
  0x75   : > { %v467_v10 = vmul.f32 %v466_v37, %v458_v12 }
  0x76   : > { %v399_v7 = vmul.f32 0.002785687, %v398_v4  ;;  %1763 = vrcp.f32 %v502_v25  ;;  %vm508_vm11 = vweird.f32 %v502_v25  ;;  %v514_v35 = vand.u32 2147483648, %v502_v25 }
  0x77   : > { %v468_v38 = vadd.f32 -0.14207031, %v467_v10  ;;  %v512_v10 = vand.u32 2147483647, %v502_v25 }
  0x78   : > { %v400_v13 = vadd.f32 -0.015866, %v399_v7  ;;  %v423_v7 = vsel %vm422_vm4, 3.1415927, %v1845_v14 }
  0x79   : > { %v469_v41 = vmul.f32 %v468_v38, %v458_v12  ;;  %vm513_vm14 = vcmp.eq.f32.partialorder %v512_v10, 8.507059e+37 }
  0x7a   : > { %v401_v5 = vmul.f32 %v400_v13, %v398_v4 }
  0x7b   : > { %v470_v29 = vadd.f32 0.19993454, %v469_v41  ;;  %v515_v41 = vor.u32 1.1754944e-38, %v514_v35 }
  0x7c   : > { %v402_v15 = vadd.f32 0.04247222, %v401_v5  ;;  %v1764_v33 = vpop.eup %1763  ;;  %v431_v5 = vsel %vm419_vm3, 2.3561945, %v1846_v24 }
  0x7d   : > { %v471_v30 = vmul.f32 %v470_v29, %v458_v12  ;;  %v504_v34 = vmul.f32 %v1764_v33, %v502_v25  ;;  %v501_v29 = vmin.f32 %v2106_v22, %v2109_v8 }
  0x7e   : > { %v403_v19 = vmul.f32 %v402_v15, %v398_v4 }
  0x7f   : > { %v472_v43 = vadd.f32 -0.33333147, %v471_v30  ;;  %v505_v37 = vsub.f32 1.0, %v504_v34 }
  0x80   : > { %v404_v11 = vadd.f32 -0.074975304, %v403_v19 }
  0x81   : > { %v473_v46 = vmul.f32 %v472_v43, %v458_v12  ;;  %v506_v38 = vmul.f32 %v1764_v33, %v505_v37 }
  0x82   : > { %v405_v27 = vmul.f32 %v404_v11, %v398_v4 }
  0x83   : > { %v474_v48 = vmul.f32 %v473_v46, %v457_v6  ;;  %v507_v30 = vadd.f32 %v1764_v33, %v506_v38 }
  0x84   : > { %v406_v28 = vadd.f32 0.1064488, %v405_v27 }
  0x85   : > { %v475_v51 = vadd.f32 %v474_v48, %v457_v6 }
  0x86   : > { %v407_v31 = vmul.f32 %v406_v28, %v398_v4 }
  0x87   : > { %v477_v54 = vsub.f32 1.5707964, %v475_v51 }
  0x89   : > { %v478_v57 = vsel %vm476_vm15, %v477_v54, %v475_v51  ;;  %vm552_vm15 = vcmp.eq.s32.totalorder %v2106_v22, inf  ;;  %v437_v22 = vand.u32 2147483648, %v1958_v20 }
  0x8a   : > { %v480_v44 = vsub.f32 3.1415927, %v478_v57 }
  0x8c   : > { %v481_v9 = vsel %vm479_vm1, %v480_v44, %v478_v57  ;;  %vm2117_vm1 = vmand %vm552_vm15, %vm553_vm0  ;;  %vm544_vm15 = vcmp.eq.f32.partialorder %v1960_v21, 0.0 }
  0x8d   : > { %v485_v63 = vsel %vm484_vm6, %v483_v45, %v481_v9  ;;  %vm426_vm6 = vcmp.ne.f32.partialorder %v1949_v16, %v1949_v16 }
  0x8e   : > { %v489_v1 = vsel %vm488_vm7, nan, %v485_v63  ;;  %vm427_vm7 = vcmp.ne.f32.partialorder %v1958_v20, %v1958_v20 }
  0x8f   : > { %v495_v3 = vsel %vm2067_vm12, %v491_v61, %v489_v1  ;;  %vm509_vm12 = vweird.f32 %v1764_v33  ;;  %vm428_vm8 = vmor %vm426_vm6, %vm427_vm7 }
  0x90   : > { %v496_v6 = vand.u32 2147483647, %v495_v3  ;;  %vm510_vm13 = vmor %vm508_vm11, %vm509_vm12  ;;  %vm542_vm11 = vcmp.lt.s32.totalorder %v1951_v17, 0  ;;  %vm546_vm12 = vcmp.ne.f32.partialorder %v1951_v17, %v1951_v17 }
  0x91   : > { %v511_v43 = vsel %vm510_vm13, %v1764_v33, %v507_v30  ;;  %vm547_vm13 = vcmp.ne.f32.partialorder %v1960_v21, %v1960_v21  ;;  %v543_v11 = vsel %vm542_vm11, 3.1415927, %v1845_v14 }
  0x92   : > { %v498_v12 = vor.u32 %v497_v2, %v496_v6  ;;  %v516_v46 = vsel %vm513_vm14, %v515_v41, %v511_v43  ;;  %vm539_vm14 = vcmp.lt.f32.partialorder %v1951_v17, 0.0  ;;  %vm548_vm0 = vmor %vm546_vm12, %vm547_vm13 }
  0x93   : > { %v517_v48 = vmul.f32 %v516_v46, %v501_v29  ;;  %v551_v28 = vsel %vm539_vm14, 2.3561945, %v1846_v24 }
  0x94   : > { %v563_v18 = vadd.f32 %v498_v12, %v378_v32  ;;  %v408_v32 = vadd.f32 -0.14207031, %v407_v31 }
  0x95   : > { %v518_v49 = vmul.f32 %v517_v48, %v517_v48 }
  0x96   : > { %v565_v23 = vmul.f32 0.5, %v563_v18  ;;  %v409_v36 = vmul.f32 %v408_v32, %v398_v4 }
  0x97   : > { %v519_v51 = vmul.f32 0.002785687, %v518_v49 }
  0x98   : > { %567 = vst [vmem:[%s2096_s6] sm:$0xff] %v565_v23  ;;  %v410_v42 = vadd.f32 0.19993454, %v409_v36 }
  0x99   : > { %v520_v52 = vadd.f32 -0.015866, %v519_v51 }
  0x9a   : > { %v411_v47 = vmul.f32 %v410_v42, %v398_v4 }
  0x9b   : > { %v521_v54 = vmul.f32 %v520_v52, %v518_v49 }
  0x9c   : > { %v412_v50 = vadd.f32 -0.33333147, %v411_v47 }
  0x9d   : > { %v522_v55 = vadd.f32 0.04247222, %v521_v54 }
  0x9e   : > { %v413_v53 = vmul.f32 %v412_v50, %v398_v4 }
  0x9f   : > { %v523_v57 = vmul.f32 %v522_v55, %v518_v49 }
  0xa0   : > { %v414_v56 = vmul.f32 %v413_v53, %v397_v0 }
  0xa1   : > { %v524_v58 = vadd.f32 -0.074975304, %v523_v57 }
  0xa2   : > { %v415_v44 = vadd.f32 %v414_v56, %v397_v0 }
  0xa3   : > { %v525_v45 = vmul.f32 %v524_v58, %v518_v49 }
  0xa4   : > { %v417_v9 = vsub.f32 1.5707964, %v415_v44 }
  0xa5   : > { %v526_v60 = vadd.f32 0.1064488, %v525_v45 }
  0xa6   : > { %v418_v63 = vsel %vm416_vm2, %v417_v9, %v415_v44 }
  0xa7   : > { %v527_v61 = vmul.f32 %v526_v60, %v518_v49  ;;  %v420_v3 = vsub.f32 3.1415927, %v418_v63 }
  0xa9   : > { %v528_v62 = vadd.f32 -0.14207031, %v527_v61  ;;  %v421_v6 = vsel %vm419_vm3, %v420_v3, %v418_v63 }
  0xaa   : > { %v425_v40 = vsel %vm424_vm5, %v423_v7, %v421_v6 }
  0xab   : > { %v529_v1 = vmul.f32 %v528_v62, %v518_v49  ;;  %v429_v18 = vsel %vm428_vm8, nan, %v425_v40 }
  0xac   : > { %v435_v16 = vsel %vm2101_vm10, %v431_v5, %v429_v18  ;;  %vm841_vm10 = vcmask 122880  }
  0xad   : > { %v530_v2 = vadd.f32 0.19993454, %v529_v1  ;;  %v436_v27 = vand.u32 2147483647, %v435_v16 }
  0xaf   : > { %v531_v4 = vmul.f32 %v530_v2, %v518_v49  ;;  %v438_v32 = vor.u32 %v437_v22, %v436_v27 }
  0xb1   : > { %v532_v0 = vadd.f32 -0.33333147, %v531_v4 }
  0xb3   : > { %v533_v39 = vmul.f32 %v532_v0, %v518_v49 }
  0xb5   : > { %v534_v12 = vmul.f32 %v533_v39, %v517_v48 }
  0xb7   : > { %v535_v13 = vadd.f32 %v534_v12, %v517_v48 }
  0xb9   : > { %v537_v23 = vsub.f32 1.5707964, %v535_v13 }
  0xbb   : > { %v538_v15 = vsel %vm536_vm9, %v537_v23, %v535_v13 }
  0xbc   : > { %v540_v19 = vsub.f32 3.1415927, %v538_v15 }
  0xbe   : > { %v541_v8 = vsel %vm539_vm14, %v540_v19, %v538_v15 }
  0xbf   : > { %v545_v25 = vsel %vm544_vm15, %v543_v11, %v541_v8 }
  0xc0   : > { %v549_v31 = vsel %vm548_vm0, nan, %v545_v25 }
  0xc1   : > { %v555_v17 = vsel %vm2117_vm1, %v551_v28, %v549_v31 }
  0xc2   : > { %v556_v14 = vand.u32 2147483647, %v555_v17 }
  0xc4   : > { %v558_v33 = vor.u32 %v557_v26, %v556_v14 }
  0xc6   : > { %v564_v34 = vadd.f32 %v558_v33, %v438_v32 }
  0xc8   : > { %v566_v21 = vmul.f32 0.5, %v564_v34 }
  0xca   : > { %568 = vst [vmem:[%s2096_s6 + $0x8] sm:$0xff] %v566_v21 }
  0xec   : > { %v585_v35 = vpop.trf.xlu0 }
  0xed   : > { %v617_v36 = vrot.slane %v585_v35, 1  ;;  %v618_v20 = vrot.slane %v585_v35, 2  ;;  %842 = vst.msk [vmem:[%s2150_s8] sm:$0x1] %vm841_vm10, %v585_v35  ;;  %v619_v24 = vrot.slane %v585_v35, 3  ;;  %v620_v37 = vrot.slane %v585_v35, 4 }
  0xee   : > { %v621_v10 = vrot.slane %v585_v35, 5  ;;  %v622_v38 = vrot.slane %v585_v35, 6  ;;  %v623_v41 = vrot.slane %v585_v35, 7 }
  0xef   : > { %843 = vst.msk [vmem:[%s2150_s8 + $0x1] sm:$0x1] %vm841_vm10, %v617_v36 }
  0xf0   : > { %844 = vst.msk [vmem:[%s2150_s8 + $0x2] sm:$0x1] %vm841_vm10, %v618_v20 }
  0xf1   : > { %845 = vst.msk [vmem:[%s2150_s8 + $0x3] sm:$0x1] %vm841_vm10, %v619_v24 }
  0xf2   : > { %846 = vst.msk [vmem:[%s2150_s8 + $0x4] sm:$0x1] %vm841_vm10, %v620_v37 }
  0xf3   : > { %847 = vst.msk [vmem:[%s2150_s8 + $0x5] sm:$0x1] %vm841_vm10, %v621_v10 }
  0xf4   : > { %v586_v42 = vpop.trf.xlu0  ;;  %848 = vst.msk [vmem:[%s2150_s8 + $0x6] sm:$0x1] %vm841_vm10, %v622_v38 }
  0xf5   : > { %v624_v29 = vrot.slane %v586_v42, 1  ;;  %v625_v30 = vrot.slane %v586_v42, 2  ;;  %849 = vst.msk [vmem:[%s2150_s8 + $0x7] sm:$0x1] %vm841_vm10, %v623_v41  ;;  %v626_v43 = vrot.slane %v586_v42, 3  ;;  %v627_v46 = vrot.slane %v586_v42, 4 }
  0xf6   : > { %850 = vst.msk [vmem:[%s2150_s8 + $0x8] sm:$0x1] %vm841_vm10, %v586_v42  ;;  %v628_v47 = vrot.slane %v586_v42, 5  ;;  %v629_v48 = vrot.slane %v586_v42, 6  ;;  %v630_v49 = vrot.slane %v586_v42, 7 }
  0xf7   : > { %851 = vst.msk [vmem:[%s2150_s8 + $0x9] sm:$0x1] %vm841_vm10, %v624_v29 }
  0xf8   : > { %852 = vst.msk [vmem:[%s2150_s8 + $0xa] sm:$0x1] %vm841_vm10, %v625_v30 }
  0xf9   : > { %853 = vst.msk [vmem:[%s2150_s8 + $0xb] sm:$0x1] %vm841_vm10, %v626_v43 }
  0xfa   : > { %854 = vst.msk [vmem:[%s2150_s8 + $0xc] sm:$0x1] %vm841_vm10, %v627_v46 }
  0xfb   : > { %855 = vst.msk [vmem:[%s2150_s8 + $0xd] sm:$0x1] %vm841_vm10, %v628_v47 }
  0xfc   : > { %v587_v50 = vpop.trf.xlu0  ;;  %856 = vst.msk [vmem:[%s2150_s8 + $0xe] sm:$0x1] %vm841_vm10, %v629_v48 }
  0xfd   : > { %v631_v51 = vrot.slane %v587_v50, 1  ;;  %v632_v52 = vrot.slane %v587_v50, 2  ;;  %857 = vst.msk [vmem:[%s2150_s8 + $0xf] sm:$0x1] %vm841_vm10, %v630_v49  ;;  %v633_v53 = vrot.slane %v587_v50, 3  ;;  %v634_v54 = vrot.slane %v587_v50, 4 }
  0xfe   : > { %858 = vst.msk [vmem:[%s2150_s8 + $0x10] sm:$0x1] %vm841_vm10, %v587_v50  ;;  %v635_v55 = vrot.slane %v587_v50, 5  ;;  %v636_v56 = vrot.slane %v587_v50, 6  ;;  %v637_v57 = vrot.slane %v587_v50, 7 }
  0xff   : > { %859 = vst.msk [vmem:[%s2150_s8 + $0x11] sm:$0x1] %vm841_vm10, %v631_v51 }
 0x100   : > { %860 = vst.msk [vmem:[%s2150_s8 + $0x12] sm:$0x1] %vm841_vm10, %v632_v52 }
 0x101   : > { %861 = vst.msk [vmem:[%s2150_s8 + $0x13] sm:$0x1] %vm841_vm10, %v633_v53 }
 0x102   : > { %862 = vst.msk [vmem:[%s2150_s8 + $0x14] sm:$0x1] %vm841_vm10, %v634_v54 }
 0x103   : > { %863 = vst.msk [vmem:[%s2150_s8 + $0x15] sm:$0x1] %vm841_vm10, %v635_v55 }
 0x104   : > { %v588_v58 = vpop.trf.xlu0  ;;  %864 = vst.msk [vmem:[%s2150_s8 + $0x16] sm:$0x1] %vm841_vm10, %v636_v56 }
 0x105   : > { %v638_v59 = vrot.slane %v588_v58, 1  ;;  %v639_v44 = vrot.slane %v588_v58, 2  ;;  %865 = vst.msk [vmem:[%s2150_s8 + $0x17] sm:$0x1] %vm841_vm10, %v637_v57  ;;  %v640_v45 = vrot.slane %v588_v58, 3  ;;  %v641_v60 = vrot.slane %v588_v58, 4 }
 0x106   : > { %866 = vst.msk [vmem:[%s2150_s8 + $0x18] sm:$0x1] %vm841_vm10, %v588_v58  ;;  %v642_v9 = vrot.slane %v588_v58, 5  ;;  %v643_v61 = vrot.slane %v588_v58, 6  ;;  %v644_v62 = vrot.slane %v588_v58, 7 }
 0x107   : > { %867 = vst.msk [vmem:[%s2150_s8 + $0x19] sm:$0x1] %vm841_vm10, %v638_v59 }
 0x108   : > { %868 = vst.msk [vmem:[%s2150_s8 + $0x1a] sm:$0x1] %vm841_vm10, %v639_v44 }
 0x109   : > { %869 = vst.msk [vmem:[%s2150_s8 + $0x1b] sm:$0x1] %vm841_vm10, %v640_v45 }
 0x10a   : > { %870 = vst.msk [vmem:[%s2150_s8 + $0x1c] sm:$0x1] %vm841_vm10, %v641_v60 }
 0x10b   : > { %871 = vst.msk [vmem:[%s2150_s8 + $0x1d] sm:$0x1] %vm841_vm10, %v642_v9 }
 0x10c   : > { %v589_v63 = vpop.trf.xlu0  ;;  %872 = vst.msk [vmem:[%s2150_s8 + $0x1e] sm:$0x1] %vm841_vm10, %v643_v61 }
 0x10d   : > { %v645_v1 = vrot.slane %v589_v63, 1  ;;  %v646_v2 = vrot.slane %v589_v63, 2  ;;  %873 = vst.msk [vmem:[%s2150_s8 + $0x1f] sm:$0x1] %vm841_vm10, %v644_v62  ;;  %v647_v3 = vrot.slane %v589_v63, 3  ;;  %v648_v4 = vrot.slane %v589_v63, 4 }
 0x10e   : > { %874 = vst.msk [vmem:[%s2150_s8 + $0x20] sm:$0x1] %vm841_vm10, %v589_v63  ;;  %v649_v0 = vrot.slane %v589_v63, 5  ;;  %v650_v6 = vrot.slane %v589_v63, 6  ;;  %v651_v7 = vrot.slane %v589_v63, 7 }
 0x10f   : > { %875 = vst.msk [vmem:[%s2150_s8 + $0x21] sm:$0x1] %vm841_vm10, %v645_v1 }
 0x110   : > { %876 = vst.msk [vmem:[%s2150_s8 + $0x22] sm:$0x1] %vm841_vm10, %v646_v2 }
 0x111   : > { %877 = vst.msk [vmem:[%s2150_s8 + $0x23] sm:$0x1] %vm841_vm10, %v647_v3 }
 0x112   : > { %878 = vst.msk [vmem:[%s2150_s8 + $0x24] sm:$0x1] %vm841_vm10, %v648_v4 }
 0x113   : > { %879 = vst.msk [vmem:[%s2150_s8 + $0x25] sm:$0x1] %vm841_vm10, %v649_v0 }
 0x114   : > { %v590_v39 = vpop.trf.xlu0  ;;  %880 = vst.msk [vmem:[%s2150_s8 + $0x26] sm:$0x1] %vm841_vm10, %v650_v6 }
 0x115   : > { %v652_v40 = vrot.slane %v590_v39, 1  ;;  %v653_v12 = vrot.slane %v590_v39, 2  ;;  %881 = vst.msk [vmem:[%s2150_s8 + $0x27] sm:$0x1] %vm841_vm10, %v651_v7  ;;  %v654_v13 = vrot.slane %v590_v39, 3  ;;  %v655_v18 = vrot.slane %v590_v39, 4 }
 0x116   : > { %882 = vst.msk [vmem:[%s2150_s8 + $0x28] sm:$0x1] %vm841_vm10, %v590_v39  ;;  %v656_v5 = vrot.slane %v590_v39, 5  ;;  %v657_v23 = vrot.slane %v590_v39, 6  ;;  %v658_v16 = vrot.slane %v590_v39, 7 }
 0x117   : > { %883 = vst.msk [vmem:[%s2150_s8 + $0x29] sm:$0x1] %vm841_vm10, %v652_v40 }
 0x118   : > { %884 = vst.msk [vmem:[%s2150_s8 + $0x2a] sm:$0x1] %vm841_vm10, %v653_v12 }
 0x119   : > { %885 = vst.msk [vmem:[%s2150_s8 + $0x2b] sm:$0x1] %vm841_vm10, %v654_v13 }
 0x11a   : > { %886 = vst.msk [vmem:[%s2150_s8 + $0x2c] sm:$0x1] %vm841_vm10, %v655_v18 }
 0x11b   : > { %887 = vst.msk [vmem:[%s2150_s8 + $0x2d] sm:$0x1] %vm841_vm10, %v656_v5 }
 0x11c   : > { %v591_v15 = vpop.trf.xlu0  ;;  %888 = vst.msk [vmem:[%s2150_s8 + $0x2e] sm:$0x1] %vm841_vm10, %v657_v23 }
 0x11d   : > { %v659_v19 = vrot.slane %v591_v15, 1  ;;  %v660_v11 = vrot.slane %v591_v15, 2  ;;  %889 = vst.msk [vmem:[%s2150_s8 + $0x2f] sm:$0x1] %vm841_vm10, %v658_v16  ;;  %v661_v27 = vrot.slane %v591_v15, 3  ;;  %v662_v22 = vrot.slane %v591_v15, 4 }
 0x11e   : > { %890 = vst.msk [vmem:[%s2150_s8 + $0x30] sm:$0x1] %vm841_vm10, %v591_v15  ;;  %v663_v8 = vrot.slane %v591_v15, 5  ;;  %v664_v28 = vrot.slane %v591_v15, 6  ;;  %v665_v25 = vrot.slane %v591_v15, 7 }
 0x11f   : > { %891 = vst.msk [vmem:[%s2150_s8 + $0x31] sm:$0x1] %vm841_vm10, %v659_v19 }
 0x120   : > { %892 = vst.msk [vmem:[%s2150_s8 + $0x32] sm:$0x1] %vm841_vm10, %v660_v11 }
 0x121   : > { %893 = vst.msk [vmem:[%s2150_s8 + $0x33] sm:$0x1] %vm841_vm10, %v661_v27 }
 0x122   : > { %894 = vst.msk [vmem:[%s2150_s8 + $0x34] sm:$0x1] %vm841_vm10, %v662_v22 }
 0x123   : > { %895 = vst.msk [vmem:[%s2150_s8 + $0x35] sm:$0x1] %vm841_vm10, %v663_v8 }
 0x124   : > { %v592_v31 = vpop.trf.xlu0  ;;  %896 = vst.msk [vmem:[%s2150_s8 + $0x36] sm:$0x1] %vm841_vm10, %v664_v28 }
 0x125   : > { %v666_v26 = vrot.slane %v592_v31, 1  ;;  %v667_v17 = vrot.slane %v592_v31, 2  ;;  %897 = vst.msk [vmem:[%s2150_s8 + $0x37] sm:$0x1] %vm841_vm10, %v665_v25  ;;  %v668_v32 = vrot.slane %v592_v31, 3  ;;  %v669_v14 = vrot.slane %v592_v31, 4 }
 0x126   : > { %898 = vst.msk [vmem:[%s2150_s8 + $0x38] sm:$0x1] %vm841_vm10, %v592_v31  ;;  %v670_v33 = vrot.slane %v592_v31, 5  ;;  %v671_v34 = vrot.slane %v592_v31, 6  ;;  %v672_v35 = vrot.slane %v592_v31, 7 }
 0x127   : > { %899 = vst.msk [vmem:[%s2150_s8 + $0x39] sm:$0x1] %vm841_vm10, %v666_v26 }
 0x128   : > { %900 = vst.msk [vmem:[%s2150_s8 + $0x3a] sm:$0x1] %vm841_vm10, %v667_v17 }
 0x129   : > { %901 = vst.msk [vmem:[%s2150_s8 + $0x3b] sm:$0x1] %vm841_vm10, %v668_v32 }
 0x12a   : > { %902 = vst.msk [vmem:[%s2150_s8 + $0x3c] sm:$0x1] %vm841_vm10, %v669_v14 }
 0x12b   : > { %903 = vst.msk [vmem:[%s2150_s8 + $0x3d] sm:$0x1] %vm841_vm10, %v670_v33 }
 0x12c   : > { %v593_v36 = vpop.trf.xlu0  ;;  %904 = vst.msk [vmem:[%s2150_s8 + $0x3e] sm:$0x1] %vm841_vm10, %v671_v34 }
 0x12d   : > { %v673_v20 = vrot.slane %v593_v36, 1  ;;  %v674_v21 = vrot.slane %v593_v36, 2  ;;  %905 = vst.msk [vmem:[%s2150_s8 + $0x3f] sm:$0x1] %vm841_vm10, %v672_v35  ;;  %v675_v24 = vrot.slane %v593_v36, 3  ;;  %v676_v37 = vrot.slane %v593_v36, 4 }
 0x12e   : > { %906 = vst.msk [vmem:[%s2150_s8 + $0x40] sm:$0x1] %vm841_vm10, %v593_v36  ;;  %v677_v10 = vrot.slane %v593_v36, 5  ;;  %v678_v38 = vrot.slane %v593_v36, 6  ;;  %v679_v41 = vrot.slane %v593_v36, 7 }
 0x12f   : > { %907 = vst.msk [vmem:[%s2150_s8 + $0x41] sm:$0x1] %vm841_vm10, %v673_v20  ;;  %v1003_v36 = vld [vmem:[%s2150_s8] sm:$0x1] (%p1903_p5)  ;;  %v1005_v20 = vld [vmem:[%s2150_s8 + $0x1] sm:$0x1] (%p1903_p5) }
 0x130   : > { %908 = vst.msk [vmem:[%s2150_s8 + $0x42] sm:$0x1] %vm841_vm10, %v674_v21  ;;  %v1007_v21 = vld [vmem:[%s2150_s8 + $0x2] sm:$0x1] (%p1903_p5) }
 0x131   : > { %909 = vst.msk [vmem:[%s2150_s8 + $0x43] sm:$0x1] %vm841_vm10, %v675_v24  ;;  %v1009_v24 = vld [vmem:[%s2150_s8 + $0x3] sm:$0x1] (%p1903_p5) }
 0x132   : > { %910 = vst.msk [vmem:[%s2150_s8 + $0x44] sm:$0x1] %vm841_vm10, %v676_v37  ;;  %v1011_v37 = vld [vmem:[%s2150_s8 + $0x4] sm:$0x1] (%p1903_p5) }
 0x133   : > { %911 = vst.msk [vmem:[%s2150_s8 + $0x45] sm:$0x1] %vm841_vm10, %v677_v10  ;;  %v1013_v10 = vld [vmem:[%s2150_s8 + $0x5] sm:$0x1] (%p1903_p5) }
 0x134   : > { %v594_v42 = vpop.trf.xlu0  ;;  %912 = vst.msk [vmem:[%s2150_s8 + $0x46] sm:$0x1] %vm841_vm10, %v678_v38  ;;  %v1015_v38 = vld [vmem:[%s2150_s8 + $0x6] sm:$0x1] (%p1903_p5) }
 0x135   : > { %v680_v29 = vrot.slane %v594_v42, 1  ;;  %v681_v30 = vrot.slane %v594_v42, 2  ;;  %913 = vst.msk [vmem:[%s2150_s8 + $0x47] sm:$0x1] %vm841_vm10, %v679_v41  ;;  %v682_v43 = vrot.slane %v594_v42, 3  ;;  %v683_v46 = vrot.slane %v594_v42, 4 }
 0x136   : > { %914 = vst.msk [vmem:[%s2150_s8 + $0x48] sm:$0x1] %vm841_vm10, %v594_v42  ;;  %v684_v47 = vrot.slane %v594_v42, 5  ;;  %v685_v48 = vrot.slane %v594_v42, 6  ;;  %v686_v49 = vrot.slane %v594_v42, 7 }
 0x137   : > { %915 = vst.msk [vmem:[%s2150_s8 + $0x49] sm:$0x1] %vm841_vm10, %v680_v29  ;;  %v1017_v41 = vld [vmem:[%s2150_s8 + $0x7] sm:$0x1] (%p1903_p5)  ;;  %v1019_v42 = vld [vmem:[%s2150_s8 + $0x8] sm:$0x1] (%p1903_p5) }
 0x138   : > { %916 = vst.msk [vmem:[%s2150_s8 + $0x4a] sm:$0x1] %vm841_vm10, %v681_v30  ;;  %v1021_v29 = vld [vmem:[%s2150_s8 + $0x9] sm:$0x1] (%p1903_p5)  ;;  %v1023_v30 = vld [vmem:[%s2150_s8 + $0xa] sm:$0x1] (%p1903_p5) }
 0x139   : > { %917 = vst.msk [vmem:[%s2150_s8 + $0x4b] sm:$0x1] %vm841_vm10, %v682_v43  ;;  %v1025_v43 = vld [vmem:[%s2150_s8 + $0xb] sm:$0x1] (%p1903_p5) }
 0x13a   : > { %918 = vst.msk [vmem:[%s2150_s8 + $0x4c] sm:$0x1] %vm841_vm10, %v683_v46  ;;  %v1027_v46 = vld [vmem:[%s2150_s8 + $0xc] sm:$0x1] (%p1903_p5) }
 0x13b   : > { %919 = vst.msk [vmem:[%s2150_s8 + $0x4d] sm:$0x1] %vm841_vm10, %v684_v47  ;;  %v1029_v47 = vld [vmem:[%s2150_s8 + $0xd] sm:$0x1] (%p1903_p5) }
 0x13c   : > { %v595_v50 = vpop.trf.xlu0  ;;  %920 = vst.msk [vmem:[%s2150_s8 + $0x4e] sm:$0x1] %vm841_vm10, %v685_v48  ;;  %v1031_v48 = vld [vmem:[%s2150_s8 + $0xe] sm:$0x1] (%p1903_p5) }
 0x13d   : > { %v687_v51 = vrot.slane %v595_v50, 1  ;;  %v688_v52 = vrot.slane %v595_v50, 2  ;;  %921 = vst.msk [vmem:[%s2150_s8 + $0x4f] sm:$0x1] %vm841_vm10, %v686_v49  ;;  %v689_v53 = vrot.slane %v595_v50, 3  ;;  %v690_v54 = vrot.slane %v595_v50, 4 }
 0x13e   : > { %922 = vst.msk [vmem:[%s2150_s8 + $0x50] sm:$0x1] %vm841_vm10, %v595_v50  ;;  %v691_v55 = vrot.slane %v595_v50, 5  ;;  %v692_v56 = vrot.slane %v595_v50, 6  ;;  %v693_v57 = vrot.slane %v595_v50, 7 }
 0x13f   : > { %923 = vst.msk [vmem:[%s2150_s8 + $0x51] sm:$0x1] %vm841_vm10, %v687_v51  ;;  %v1033_v49 = vld [vmem:[%s2150_s8 + $0xf] sm:$0x1] (%p1903_p5)  ;;  %v1035_v50 = vld [vmem:[%s2150_s8 + $0x10] sm:$0x1] (%p1903_p5) }
 0x140   : > { %924 = vst.msk [vmem:[%s2150_s8 + $0x52] sm:$0x1] %vm841_vm10, %v688_v52  ;;  %v1037_v51 = vld [vmem:[%s2150_s8 + $0x11] sm:$0x1] (%p1903_p5)  ;;  %v1039_v52 = vld [vmem:[%s2150_s8 + $0x12] sm:$0x1] (%p1903_p5) }
 0x141   : > { %925 = vst.msk [vmem:[%s2150_s8 + $0x53] sm:$0x1] %vm841_vm10, %v689_v53  ;;  %v1041_v53 = vld [vmem:[%s2150_s8 + $0x13] sm:$0x1] (%p1903_p5) }
 0x142   : > { %926 = vst.msk [vmem:[%s2150_s8 + $0x54] sm:$0x1] %vm841_vm10, %v690_v54  ;;  %v1043_v54 = vld [vmem:[%s2150_s8 + $0x14] sm:$0x1] (%p1903_p5) }
 0x143   : > { %927 = vst.msk [vmem:[%s2150_s8 + $0x55] sm:$0x1] %vm841_vm10, %v691_v55  ;;  %v1045_v55 = vld [vmem:[%s2150_s8 + $0x15] sm:$0x1] (%p1903_p5) }
 0x144   : > { %v596_v58 = vpop.trf.xlu0  ;;  %928 = vst.msk [vmem:[%s2150_s8 + $0x56] sm:$0x1] %vm841_vm10, %v692_v56  ;;  %v1047_v56 = vld [vmem:[%s2150_s8 + $0x16] sm:$0x1] (%p1903_p5) }
 0x145   : > { %v694_v59 = vrot.slane %v596_v58, 1  ;;  %v695_v44 = vrot.slane %v596_v58, 2  ;;  %929 = vst.msk [vmem:[%s2150_s8 + $0x57] sm:$0x1] %vm841_vm10, %v693_v57  ;;  %v696_v45 = vrot.slane %v596_v58, 3  ;;  %v697_v60 = vrot.slane %v596_v58, 4 }
 0x146   : > { %930 = vst.msk [vmem:[%s2150_s8 + $0x58] sm:$0x1] %vm841_vm10, %v596_v58  ;;  %v698_v9 = vrot.slane %v596_v58, 5  ;;  %v699_v61 = vrot.slane %v596_v58, 6  ;;  %v700_v62 = vrot.slane %v596_v58, 7 }
 0x147   : > { %931 = vst.msk [vmem:[%s2150_s8 + $0x59] sm:$0x1] %vm841_vm10, %v694_v59  ;;  %v1049_v57 = vld [vmem:[%s2150_s8 + $0x17] sm:$0x1] (%p1903_p5)  ;;  %v1051_v58 = vld [vmem:[%s2150_s8 + $0x18] sm:$0x1] (%p1903_p5) }
 0x148   : > { %932 = vst.msk [vmem:[%s2150_s8 + $0x5a] sm:$0x1] %vm841_vm10, %v695_v44  ;;  %v1053_v59 = vld [vmem:[%s2150_s8 + $0x19] sm:$0x1] (%p1903_p5)  ;;  %v1055_v44 = vld [vmem:[%s2150_s8 + $0x1a] sm:$0x1] (%p1903_p5) }
 0x149   : > { %933 = vst.msk [vmem:[%s2150_s8 + $0x5b] sm:$0x1] %vm841_vm10, %v696_v45  ;;  %v1057_v45 = vld [vmem:[%s2150_s8 + $0x1b] sm:$0x1] (%p1903_p5) }
 0x14a   : > { %934 = vst.msk [vmem:[%s2150_s8 + $0x5c] sm:$0x1] %vm841_vm10, %v697_v60  ;;  %v1059_v60 = vld [vmem:[%s2150_s8 + $0x1c] sm:$0x1] (%p1903_p5) }
 0x14b   : > { %935 = vst.msk [vmem:[%s2150_s8 + $0x5d] sm:$0x1] %vm841_vm10, %v698_v9  ;;  %v1061_v9 = vld [vmem:[%s2150_s8 + $0x1d] sm:$0x1] (%p1903_p5) }
 0x14c   : > { %v597_v63 = vpop.trf.xlu0  ;;  %936 = vst.msk [vmem:[%s2150_s8 + $0x5e] sm:$0x1] %vm841_vm10, %v699_v61  ;;  %v1063_v61 = vld [vmem:[%s2150_s8 + $0x1e] sm:$0x1] (%p1903_p5) }
 0x14d   : > { %v701_v1 = vrot.slane %v597_v63, 1  ;;  %v702_v2 = vrot.slane %v597_v63, 2  ;;  %937 = vst.msk [vmem:[%s2150_s8 + $0x5f] sm:$0x1] %vm841_vm10, %v700_v62  ;;  %v703_v3 = vrot.slane %v597_v63, 3  ;;  %v704_v4 = vrot.slane %v597_v63, 4 }
 0x14e   : > { %938 = vst.msk [vmem:[%s2150_s8 + $0x60] sm:$0x1] %vm841_vm10, %v597_v63  ;;  %v705_v0 = vrot.slane %v597_v63, 5  ;;  %v706_v6 = vrot.slane %v597_v63, 6  ;;  %v707_v7 = vrot.slane %v597_v63, 7 }
 0x14f   : > { %939 = vst.msk [vmem:[%s2150_s8 + $0x61] sm:$0x1] %vm841_vm10, %v701_v1  ;;  %v1065_v62 = vld [vmem:[%s2150_s8 + $0x1f] sm:$0x1] (%p1903_p5)  ;;  %v1067_v63 = vld [vmem:[%s2150_s8 + $0x20] sm:$0x1] (%p1903_p5) }
 0x150   : > { %940 = vst.msk [vmem:[%s2150_s8 + $0x62] sm:$0x1] %vm841_vm10, %v702_v2  ;;  %v1069_v1 = vld [vmem:[%s2150_s8 + $0x21] sm:$0x1] (%p1903_p5)  ;;  %v1071_v2 = vld [vmem:[%s2150_s8 + $0x22] sm:$0x1] (%p1903_p5) }
 0x151   : > { %941 = vst.msk [vmem:[%s2150_s8 + $0x63] sm:$0x1] %vm841_vm10, %v703_v3  ;;  %v1073_v3 = vld [vmem:[%s2150_s8 + $0x23] sm:$0x1] (%p1903_p5) }
 0x152   : > { %942 = vst.msk [vmem:[%s2150_s8 + $0x64] sm:$0x1] %vm841_vm10, %v704_v4  ;;  %v1075_v4 = vld [vmem:[%s2150_s8 + $0x24] sm:$0x1] (%p1903_p5) }
 0x153   : > { %943 = vst.msk [vmem:[%s2150_s8 + $0x65] sm:$0x1] %vm841_vm10, %v705_v0  ;;  %v1077_v0 = vld [vmem:[%s2150_s8 + $0x25] sm:$0x1] (%p1903_p5) }
 0x154   : > { %v598_v39 = vpop.trf.xlu0  ;;  %944 = vst.msk [vmem:[%s2150_s8 + $0x66] sm:$0x1] %vm841_vm10, %v706_v6  ;;  %v1079_v6 = vld [vmem:[%s2150_s8 + $0x26] sm:$0x1] (%p1903_p5) }
 0x155   : > { %v708_v40 = vrot.slane %v598_v39, 1  ;;  %v709_v12 = vrot.slane %v598_v39, 2  ;;  %945 = vst.msk [vmem:[%s2150_s8 + $0x67] sm:$0x1] %vm841_vm10, %v707_v7  ;;  %v710_v13 = vrot.slane %v598_v39, 3  ;;  %v711_v18 = vrot.slane %v598_v39, 4 }
 0x156   : > { %946 = vst.msk [vmem:[%s2150_s8 + $0x68] sm:$0x1] %vm841_vm10, %v598_v39  ;;  %v712_v5 = vrot.slane %v598_v39, 5  ;;  %v713_v23 = vrot.slane %v598_v39, 6  ;;  %v714_v16 = vrot.slane %v598_v39, 7 }
 0x157   : > { %947 = vst.msk [vmem:[%s2150_s8 + $0x69] sm:$0x1] %vm841_vm10, %v708_v40  ;;  %v1081_v7 = vld [vmem:[%s2150_s8 + $0x27] sm:$0x1] (%p1903_p5)  ;;  %v1083_v39 = vld [vmem:[%s2150_s8 + $0x28] sm:$0x1] (%p1903_p5) }
 0x158   : > { %948 = vst.msk [vmem:[%s2150_s8 + $0x6a] sm:$0x1] %vm841_vm10, %v709_v12  ;;  %v1085_v40 = vld [vmem:[%s2150_s8 + $0x29] sm:$0x1] (%p1903_p5)  ;;  %v1087_v12 = vld [vmem:[%s2150_s8 + $0x2a] sm:$0x1] (%p1903_p5) }
 0x159   : > { %949 = vst.msk [vmem:[%s2150_s8 + $0x6b] sm:$0x1] %vm841_vm10, %v710_v13  ;;  %v1089_v13 = vld [vmem:[%s2150_s8 + $0x2b] sm:$0x1] (%p1903_p5) }
 0x15a   : > { %950 = vst.msk [vmem:[%s2150_s8 + $0x6c] sm:$0x1] %vm841_vm10, %v711_v18  ;;  %v1091_v18 = vld [vmem:[%s2150_s8 + $0x2c] sm:$0x1] (%p1903_p5) }
 0x15b   : > { %951 = vst.msk [vmem:[%s2150_s8 + $0x6d] sm:$0x1] %vm841_vm10, %v712_v5  ;;  %v1093_v5 = vld [vmem:[%s2150_s8 + $0x2d] sm:$0x1] (%p1903_p5) }
 0x15c   : > { %v599_v15 = vpop.trf.xlu0  ;;  %952 = vst.msk [vmem:[%s2150_s8 + $0x6e] sm:$0x1] %vm841_vm10, %v713_v23  ;;  %v1095_v23 = vld [vmem:[%s2150_s8 + $0x2e] sm:$0x1] (%p1903_p5) }
 0x15d   : > { %v715_v19 = vrot.slane %v599_v15, 1  ;;  %v716_v11 = vrot.slane %v599_v15, 2  ;;  %953 = vst.msk [vmem:[%s2150_s8 + $0x6f] sm:$0x1] %vm841_vm10, %v714_v16  ;;  %v717_v27 = vrot.slane %v599_v15, 3  ;;  %v718_v22 = vrot.slane %v599_v15, 4 }
 0x15e   : > { %954 = vst.msk [vmem:[%s2150_s8 + $0x70] sm:$0x1] %vm841_vm10, %v599_v15  ;;  %v719_v8 = vrot.slane %v599_v15, 5  ;;  %v720_v28 = vrot.slane %v599_v15, 6  ;;  %v721_v25 = vrot.slane %v599_v15, 7 }
 0x15f   : > { %955 = vst.msk [vmem:[%s2150_s8 + $0x71] sm:$0x1] %vm841_vm10, %v715_v19  ;;  %v1097_v16 = vld [vmem:[%s2150_s8 + $0x2f] sm:$0x1] (%p1903_p5)  ;;  %v1099_v15 = vld [vmem:[%s2150_s8 + $0x30] sm:$0x1] (%p1903_p5) }
 0x160   : > { %956 = vst.msk [vmem:[%s2150_s8 + $0x72] sm:$0x1] %vm841_vm10, %v716_v11  ;;  %v1101_v19 = vld [vmem:[%s2150_s8 + $0x31] sm:$0x1] (%p1903_p5)  ;;  %v1103_v11 = vld [vmem:[%s2150_s8 + $0x32] sm:$0x1] (%p1903_p5) }
 0x161   : > { %957 = vst.msk [vmem:[%s2150_s8 + $0x73] sm:$0x1] %vm841_vm10, %v717_v27  ;;  %v1105_v27 = vld [vmem:[%s2150_s8 + $0x33] sm:$0x1] (%p1903_p5) }
 0x162   : > { %958 = vst.msk [vmem:[%s2150_s8 + $0x74] sm:$0x1] %vm841_vm10, %v718_v22  ;;  %v1107_v22 = vld [vmem:[%s2150_s8 + $0x34] sm:$0x1] (%p1903_p5) }
 0x163   : > { %959 = vst.msk [vmem:[%s2150_s8 + $0x75] sm:$0x1] %vm841_vm10, %v719_v8  ;;  %v1109_v8 = vld [vmem:[%s2150_s8 + $0x35] sm:$0x1] (%p1903_p5) }
 0x164   : > { %v600_v31 = vpop.trf.xlu0  ;;  %960 = vst.msk [vmem:[%s2150_s8 + $0x76] sm:$0x1] %vm841_vm10, %v720_v28  ;;  %v1111_v28 = vld [vmem:[%s2150_s8 + $0x36] sm:$0x1] (%p1903_p5) }
 0x165   : > { %v722_v26 = vrot.slane %v600_v31, 1  ;;  %v723_v17 = vrot.slane %v600_v31, 2  ;;  %961 = vst.msk [vmem:[%s2150_s8 + $0x77] sm:$0x1] %vm841_vm10, %v721_v25  ;;  %v724_v32 = vrot.slane %v600_v31, 3  ;;  %v725_v14 = vrot.slane %v600_v31, 4 }
 0x166   : > { %962 = vst.msk [vmem:[%s2150_s8 + $0x78] sm:$0x1] %vm841_vm10, %v600_v31  ;;  %v726_v33 = vrot.slane %v600_v31, 5  ;;  %v727_v34 = vrot.slane %v600_v31, 6  ;;  %v728_v35 = vrot.slane %v600_v31, 7 }
 0x167   : > { %963 = vst.msk [vmem:[%s2150_s8 + $0x79] sm:$0x1] %vm841_vm10, %v722_v26  ;;  %v1113_v25 = vld [vmem:[%s2150_s8 + $0x37] sm:$0x1] (%p1903_p5)  ;;  %v1115_v31 = vld [vmem:[%s2150_s8 + $0x38] sm:$0x1] (%p1903_p5) }
 0x168   : > { %964 = vst.msk [vmem:[%s2150_s8 + $0x7a] sm:$0x1] %vm841_vm10, %v723_v17  ;;  %v1117_v26 = vld [vmem:[%s2150_s8 + $0x39] sm:$0x1] (%p1903_p5)  ;;  %v1119_v17 = vld [vmem:[%s2150_s8 + $0x3a] sm:$0x1] (%p1903_p5) }
 0x169   : > { %965 = vst.msk [vmem:[%s2150_s8 + $0x7b] sm:$0x1] %vm841_vm10, %v724_v32  ;;  %981 = sbr.rel (!%p1903_p5) target bundleno = 494 (0x1ee), region = 66  ;;  %v1121_v32 = vld [vmem:[%s2150_s8 + $0x3b] sm:$0x1] (%p1903_p5) }
 0x16a   : > { %966 = vst.msk [vmem:[%s2150_s8 + $0x7c] sm:$0x1] %vm841_vm10, %v725_v14  ;;  %v1123_v14 = vld [vmem:[%s2150_s8 + $0x3c] sm:$0x1] (%p1903_p5) }
 0x16b   : > { %967 = vst.msk [vmem:[%s2150_s8 + $0x7d] sm:$0x1] %vm841_vm10, %v726_v33  ;;  %v1125_v33 = vld [vmem:[%s2150_s8 + $0x3d] sm:$0x1] (%p1903_p5) }
 0x16c   : > { %968 = vst.msk [vmem:[%s2150_s8 + $0x7e] sm:$0x1] %vm841_vm10, %v727_v34  ;;  %v1127_v34 = vld [vmem:[%s2150_s8 + $0x3e] sm:$0x1] (%p1903_p5) }
 0x16d   : > { %969 = vst.msk [vmem:[%s2150_s8 + $0x7f] sm:$0x1] %vm841_vm10, %v728_v35  ;;  %v1129_v35 = vld [vmem:[%s2150_s8 + $0x3f] sm:$0x1] (%p1903_p5) }
 0x16e   : > { %1004 = vst [vmem:[%s2416_s20] sm:$0x1] %v1003_v36  ;;  %v1131_v36 = vld [vmem:[%s2150_s8 + $0x40] sm:$0x1] }
 0x16f   : > { %1006 = vst [vmem:[%s2416_s20 + $0x2] sm:$0x1] %v1005_v20  ;;  %v1133_v20 = vld [vmem:[%s2150_s8 + $0x41] sm:$0x1] }
 0x170   : > { %1008 = vst [vmem:[%s2416_s20 + $0x4] sm:$0x1] %v1007_v21  ;;  %v1135_v21 = vld [vmem:[%s2150_s8 + $0x42] sm:$0x1] }
 0x171   : > { %1010 = vst [vmem:[%s2416_s20 + $0x6] sm:$0x1] %v1009_v24  ;;  %v1137_v24 = vld [vmem:[%s2150_s8 + $0x43] sm:$0x1] }
 0x172   : > { %1012 = vst [vmem:[%s2416_s20 + $0x8] sm:$0x1] %v1011_v37  ;;  %v1139_v37 = vld [vmem:[%s2150_s8 + $0x44] sm:$0x1] }
 0x173   : > { %1014 = vst [vmem:[%s2416_s20 + $0xa] sm:$0x1] %v1013_v10  ;;  %v1141_v10 = vld [vmem:[%s2150_s8 + $0x45] sm:$0x1] }
 0x174   : > { %1016 = vst [vmem:[%s2416_s20 + $0xc] sm:$0x1] %v1015_v38  ;;  %v1143_v38 = vld [vmem:[%s2150_s8 + $0x46] sm:$0x1] }
 0x175   : > { %1018 = vst [vmem:[%s2416_s20 + $0xe] sm:$0x1] %v1017_v41  ;;  %v1145_v41 = vld [vmem:[%s2150_s8 + $0x47] sm:$0x1] }
 0x176   : > { %1020 = vst [vmem:[%s2416_s20 + $0x10] sm:$0x1] %v1019_v42  ;;  %v1147_v42 = vld [vmem:[%s2150_s8 + $0x48] sm:$0x1] }
 0x177   : > { %1022 = vst [vmem:[%s2416_s20 + $0x12] sm:$0x1] %v1021_v29  ;;  %v1149_v29 = vld [vmem:[%s2150_s8 + $0x49] sm:$0x1] }
 0x178   : > { %1024 = vst [vmem:[%s2416_s20 + $0x14] sm:$0x1] %v1023_v30  ;;  %v1151_v30 = vld [vmem:[%s2150_s8 + $0x4a] sm:$0x1] }
 0x179   : > { %1026 = vst [vmem:[%s2416_s20 + $0x16] sm:$0x1] %v1025_v43  ;;  %v1153_v43 = vld [vmem:[%s2150_s8 + $0x4b] sm:$0x1] }
 0x17a   : > { %1028 = vst [vmem:[%s2416_s20 + $0x18] sm:$0x1] %v1027_v46  ;;  %v1155_v46 = vld [vmem:[%s2150_s8 + $0x4c] sm:$0x1] }
 0x17b   : > { %1030 = vst [vmem:[%s2416_s20 + $0x1a] sm:$0x1] %v1029_v47  ;;  %v1157_v47 = vld [vmem:[%s2150_s8 + $0x4d] sm:$0x1] }
 0x17c   : > { %1032 = vst [vmem:[%s2416_s20 + $0x1c] sm:$0x1] %v1031_v48  ;;  %v1159_v48 = vld [vmem:[%s2150_s8 + $0x4e] sm:$0x1] }
 0x17d   : > { %1034 = vst [vmem:[%s2416_s20 + $0x1e] sm:$0x1] %v1033_v49  ;;  %v1161_v49 = vld [vmem:[%s2150_s8 + $0x4f] sm:$0x1] }
 0x17e   : > { %1036 = vst [vmem:[%s2416_s20 + $0x20] sm:$0x1] %v1035_v50  ;;  %v1163_v50 = vld [vmem:[%s2150_s8 + $0x50] sm:$0x1] }
 0x17f   : > { %1038 = vst [vmem:[%s2416_s20 + $0x22] sm:$0x1] %v1037_v51  ;;  %v1165_v51 = vld [vmem:[%s2150_s8 + $0x51] sm:$0x1] }
 0x180   : > { %1040 = vst [vmem:[%s2416_s20 + $0x24] sm:$0x1] %v1039_v52  ;;  %v1167_v52 = vld [vmem:[%s2150_s8 + $0x52] sm:$0x1] }
 0x181   : > { %1042 = vst [vmem:[%s2416_s20 + $0x26] sm:$0x1] %v1041_v53  ;;  %v1169_v53 = vld [vmem:[%s2150_s8 + $0x53] sm:$0x1] }
 0x182   : > { %1044 = vst [vmem:[%s2416_s20 + $0x28] sm:$0x1] %v1043_v54  ;;  %v1171_v54 = vld [vmem:[%s2150_s8 + $0x54] sm:$0x1] }
 0x183   : > { %1046 = vst [vmem:[%s2416_s20 + $0x2a] sm:$0x1] %v1045_v55  ;;  %v1173_v55 = vld [vmem:[%s2150_s8 + $0x55] sm:$0x1] }
 0x184   : > { %1048 = vst [vmem:[%s2416_s20 + $0x2c] sm:$0x1] %v1047_v56  ;;  %v1175_v56 = vld [vmem:[%s2150_s8 + $0x56] sm:$0x1] }
 0x185   : > { %1050 = vst [vmem:[%s2416_s20 + $0x2e] sm:$0x1] %v1049_v57  ;;  %v1177_v57 = vld [vmem:[%s2150_s8 + $0x57] sm:$0x1] }
 0x186   : > { %1052 = vst [vmem:[%s2416_s20 + $0x30] sm:$0x1] %v1051_v58  ;;  %v1179_v58 = vld [vmem:[%s2150_s8 + $0x58] sm:$0x1] }
 0x187   : > { %1054 = vst [vmem:[%s2416_s20 + $0x32] sm:$0x1] %v1053_v59  ;;  %v1181_v59 = vld [vmem:[%s2150_s8 + $0x59] sm:$0x1] }
 0x188   : > { %1056 = vst [vmem:[%s2416_s20 + $0x34] sm:$0x1] %v1055_v44  ;;  %v1183_v44 = vld [vmem:[%s2150_s8 + $0x5a] sm:$0x1] }
 0x189   : > { %1058 = vst [vmem:[%s2416_s20 + $0x36] sm:$0x1] %v1057_v45  ;;  %v1185_v45 = vld [vmem:[%s2150_s8 + $0x5b] sm:$0x1] }
 0x18a   : > { %1060 = vst [vmem:[%s2416_s20 + $0x38] sm:$0x1] %v1059_v60  ;;  %v1187_v60 = vld [vmem:[%s2150_s8 + $0x5c] sm:$0x1] }
 0x18b   : > { %1062 = vst [vmem:[%s2416_s20 + $0x3a] sm:$0x1] %v1061_v9  ;;  %v1189_v9 = vld [vmem:[%s2150_s8 + $0x5d] sm:$0x1] }
 0x18c   : > { %1064 = vst [vmem:[%s2416_s20 + $0x3c] sm:$0x1] %v1063_v61  ;;  %v1191_v61 = vld [vmem:[%s2150_s8 + $0x5e] sm:$0x1] }
 0x18d   : > { %1066 = vst [vmem:[%s2416_s20 + $0x3e] sm:$0x1] %v1065_v62  ;;  %v1193_v62 = vld [vmem:[%s2150_s8 + $0x5f] sm:$0x1] }
 0x18e   : > { %1068 = vst [vmem:[%s2416_s20 + $0x40] sm:$0x1] %v1067_v63  ;;  %v1195_v63 = vld [vmem:[%s2150_s8 + $0x60] sm:$0x1] }
 0x18f   : > { %1070 = vst [vmem:[%s2416_s20 + $0x42] sm:$0x1] %v1069_v1  ;;  %v1197_v1 = vld [vmem:[%s2150_s8 + $0x61] sm:$0x1] }
 0x190   : > { %1072 = vst [vmem:[%s2416_s20 + $0x44] sm:$0x1] %v1071_v2  ;;  %v1199_v2 = vld [vmem:[%s2150_s8 + $0x62] sm:$0x1] }
 0x191   : > { %1074 = vst [vmem:[%s2416_s20 + $0x46] sm:$0x1] %v1073_v3  ;;  %v1201_v3 = vld [vmem:[%s2150_s8 + $0x63] sm:$0x1] }
 0x192   : > { %1076 = vst [vmem:[%s2416_s20 + $0x48] sm:$0x1] %v1075_v4  ;;  %v1203_v4 = vld [vmem:[%s2150_s8 + $0x64] sm:$0x1] }
 0x193   : > { %1078 = vst [vmem:[%s2416_s20 + $0x4a] sm:$0x1] %v1077_v0  ;;  %v1205_v0 = vld [vmem:[%s2150_s8 + $0x65] sm:$0x1] }
 0x194   : > { %1080 = vst [vmem:[%s2416_s20 + $0x4c] sm:$0x1] %v1079_v6  ;;  %v1207_v6 = vld [vmem:[%s2150_s8 + $0x66] sm:$0x1] }
 0x195   : > { %1082 = vst [vmem:[%s2416_s20 + $0x4e] sm:$0x1] %v1081_v7  ;;  %v1209_v7 = vld [vmem:[%s2150_s8 + $0x67] sm:$0x1] }
 0x196   : > { %1084 = vst [vmem:[%s2416_s20 + $0x50] sm:$0x1] %v1083_v39  ;;  %v1211_v39 = vld [vmem:[%s2150_s8 + $0x68] sm:$0x1] }
 0x197   : > { %1086 = vst [vmem:[%s2416_s20 + $0x52] sm:$0x1] %v1085_v40  ;;  %v1213_v40 = vld [vmem:[%s2150_s8 + $0x69] sm:$0x1] }
 0x198   : > { %1088 = vst [vmem:[%s2416_s20 + $0x54] sm:$0x1] %v1087_v12  ;;  %v1215_v12 = vld [vmem:[%s2150_s8 + $0x6a] sm:$0x1] }
 0x199   : > { %1090 = vst [vmem:[%s2416_s20 + $0x56] sm:$0x1] %v1089_v13  ;;  %v1217_v13 = vld [vmem:[%s2150_s8 + $0x6b] sm:$0x1] }
 0x19a   : > { %1092 = vst [vmem:[%s2416_s20 + $0x58] sm:$0x1] %v1091_v18  ;;  %v1219_v18 = vld [vmem:[%s2150_s8 + $0x6c] sm:$0x1] }
 0x19b   : > { %1094 = vst [vmem:[%s2416_s20 + $0x5a] sm:$0x1] %v1093_v5  ;;  %v1221_v5 = vld [vmem:[%s2150_s8 + $0x6d] sm:$0x1] }
 0x19c   : > { %1096 = vst [vmem:[%s2416_s20 + $0x5c] sm:$0x1] %v1095_v23  ;;  %v1223_v23 = vld [vmem:[%s2150_s8 + $0x6e] sm:$0x1] }
 0x19d   : > { %1098 = vst [vmem:[%s2416_s20 + $0x5e] sm:$0x1] %v1097_v16  ;;  %v1225_v16 = vld [vmem:[%s2150_s8 + $0x6f] sm:$0x1] }
 0x19e   : > { %1100 = vst [vmem:[%s2416_s20 + $0x60] sm:$0x1] %v1099_v15  ;;  %v1227_v15 = vld [vmem:[%s2150_s8 + $0x70] sm:$0x1] }
 0x19f   : > { %1102 = vst [vmem:[%s2416_s20 + $0x62] sm:$0x1] %v1101_v19  ;;  %v1229_v19 = vld [vmem:[%s2150_s8 + $0x71] sm:$0x1] }
 0x1a0   : > { %1104 = vst [vmem:[%s2416_s20 + $0x64] sm:$0x1] %v1103_v11  ;;  %v1231_v11 = vld [vmem:[%s2150_s8 + $0x72] sm:$0x1] }
 0x1a1   : > { %1106 = vst [vmem:[%s2416_s20 + $0x66] sm:$0x1] %v1105_v27  ;;  %v1233_v27 = vld [vmem:[%s2150_s8 + $0x73] sm:$0x1] }
 0x1a2   : > { %1108 = vst [vmem:[%s2416_s20 + $0x68] sm:$0x1] %v1107_v22  ;;  %v1235_v22 = vld [vmem:[%s2150_s8 + $0x74] sm:$0x1] }
 0x1a3   : > { %1110 = vst [vmem:[%s2416_s20 + $0x6a] sm:$0x1] %v1109_v8  ;;  %v1237_v8 = vld [vmem:[%s2150_s8 + $0x75] sm:$0x1] }
 0x1a4   : > { %1112 = vst [vmem:[%s2416_s20 + $0x6c] sm:$0x1] %v1111_v28  ;;  %v1239_v28 = vld [vmem:[%s2150_s8 + $0x76] sm:$0x1] }
 0x1a5   : > { %1114 = vst [vmem:[%s2416_s20 + $0x6e] sm:$0x1] %v1113_v25  ;;  %v1241_v25 = vld [vmem:[%s2150_s8 + $0x77] sm:$0x1] }
 0x1a6   : > { %1116 = vst [vmem:[%s2416_s20 + $0x70] sm:$0x1] %v1115_v31  ;;  %v1243_v31 = vld [vmem:[%s2150_s8 + $0x78] sm:$0x1] }
 0x1a7   : > { %1118 = vst [vmem:[%s2416_s20 + $0x72] sm:$0x1] %v1117_v26  ;;  %v1245_v26 = vld [vmem:[%s2150_s8 + $0x79] sm:$0x1] }
 0x1a8   : > { %1120 = vst [vmem:[%s2416_s20 + $0x74] sm:$0x1] %v1119_v17  ;;  %v1247_v17 = vld [vmem:[%s2150_s8 + $0x7a] sm:$0x1] }
 0x1a9   : > { %1122 = vst [vmem:[%s2416_s20 + $0x76] sm:$0x1] %v1121_v32  ;;  %v1249_v32 = vld [vmem:[%s2150_s8 + $0x7b] sm:$0x1] }
 0x1aa   : > { %1124 = vst [vmem:[%s2416_s20 + $0x78] sm:$0x1] %v1123_v14  ;;  %v1251_v14 = vld [vmem:[%s2150_s8 + $0x7c] sm:$0x1] }
 0x1ab   : > { %1126 = vst [vmem:[%s2416_s20 + $0x7a] sm:$0x1] %v1125_v33  ;;  %v1253_v33 = vld [vmem:[%s2150_s8 + $0x7d] sm:$0x1] }
 0x1ac   : > { %1128 = vst [vmem:[%s2416_s20 + $0x7c] sm:$0x1] %v1127_v34  ;;  %v1255_v34 = vld [vmem:[%s2150_s8 + $0x7e] sm:$0x1] }
 0x1ad   : > { %1130 = vst [vmem:[%s2416_s20 + $0x7e] sm:$0x1] %v1129_v35  ;;  %v1257_v35 = vld [vmem:[%s2150_s8 + $0x7f] sm:$0x1] }
 0x1ae   : > { %1132 = vst [vmem:[%s2416_s20 + $0x80] sm:$0x1] %v1131_v36 }
 0x1af   : > { %1134 = vst [vmem:[%s2416_s20 + $0x82] sm:$0x1] %v1133_v20 }
 0x1b0   : > { %1136 = vst [vmem:[%s2416_s20 + $0x84] sm:$0x1] %v1135_v21 }
 0x1b1   : > { %1138 = vst [vmem:[%s2416_s20 + $0x86] sm:$0x1] %v1137_v24 }
 0x1b2   : > { %1140 = vst [vmem:[%s2416_s20 + $0x88] sm:$0x1] %v1139_v37 }
 0x1b3   : > { %1142 = vst [vmem:[%s2416_s20 + $0x8a] sm:$0x1] %v1141_v10 }
 0x1b4   : > { %1144 = vst [vmem:[%s2416_s20 + $0x8c] sm:$0x1] %v1143_v38 }
 0x1b5   : > { %1146 = vst [vmem:[%s2416_s20 + $0x8e] sm:$0x1] %v1145_v41 }
 0x1b6   : > { %1148 = vst [vmem:[%s2416_s20 + $0x90] sm:$0x1] %v1147_v42 }
 0x1b7   : > { %1150 = vst [vmem:[%s2416_s20 + $0x92] sm:$0x1] %v1149_v29 }
 0x1b8   : > { %1152 = vst [vmem:[%s2416_s20 + $0x94] sm:$0x1] %v1151_v30 }
 0x1b9   : > { %1154 = vst [vmem:[%s2416_s20 + $0x96] sm:$0x1] %v1153_v43 }
 0x1ba   : > { %1156 = vst [vmem:[%s2416_s20 + $0x98] sm:$0x1] %v1155_v46 }
 0x1bb   : > { %1158 = vst [vmem:[%s2416_s20 + $0x9a] sm:$0x1] %v1157_v47 }
 0x1bc   : > { %1160 = vst [vmem:[%s2416_s20 + $0x9c] sm:$0x1] %v1159_v48 }
 0x1bd   : > { %1162 = vst [vmem:[%s2416_s20 + $0x9e] sm:$0x1] %v1161_v49 }
 0x1be   : > { %1164 = vst [vmem:[%s2416_s20 + $0xa0] sm:$0x1] %v1163_v50 }
 0x1bf   : > { %1166 = vst [vmem:[%s2416_s20 + $0xa2] sm:$0x1] %v1165_v51 }
 0x1c0   : > { %1168 = vst [vmem:[%s2416_s20 + $0xa4] sm:$0x1] %v1167_v52 }
 0x1c1   : > { %1170 = vst [vmem:[%s2416_s20 + $0xa6] sm:$0x1] %v1169_v53 }
 0x1c2   : > { %1172 = vst [vmem:[%s2416_s20 + $0xa8] sm:$0x1] %v1171_v54 }
 0x1c3   : > { %1174 = vst [vmem:[%s2416_s20 + $0xaa] sm:$0x1] %v1173_v55 }
 0x1c4   : > { %1176 = vst [vmem:[%s2416_s20 + $0xac] sm:$0x1] %v1175_v56 }
 0x1c5   : > { %1178 = vst [vmem:[%s2416_s20 + $0xae] sm:$0x1] %v1177_v57 }
 0x1c6   : > { %1180 = vst [vmem:[%s2416_s20 + $0xb0] sm:$0x1] %v1179_v58 }
 0x1c7   : > { %1182 = vst [vmem:[%s2416_s20 + $0xb2] sm:$0x1] %v1181_v59 }
 0x1c8   : > { %1184 = vst [vmem:[%s2416_s20 + $0xb4] sm:$0x1] %v1183_v44 }
 0x1c9   : > { %1186 = vst [vmem:[%s2416_s20 + $0xb6] sm:$0x1] %v1185_v45 }
 0x1ca   : > { %1188 = vst [vmem:[%s2416_s20 + $0xb8] sm:$0x1] %v1187_v60 }
 0x1cb   : > { %1190 = vst [vmem:[%s2416_s20 + $0xba] sm:$0x1] %v1189_v9 }
 0x1cc   : > { %1192 = vst [vmem:[%s2416_s20 + $0xbc] sm:$0x1] %v1191_v61 }
 0x1cd   : > { %1194 = vst [vmem:[%s2416_s20 + $0xbe] sm:$0x1] %v1193_v62 }
 0x1ce   : > { %1196 = vst [vmem:[%s2416_s20 + $0xc0] sm:$0x1] %v1195_v63 }
 0x1cf   : > { %1198 = vst [vmem:[%s2416_s20 + $0xc2] sm:$0x1] %v1197_v1 }
 0x1d0   : > { %1200 = vst [vmem:[%s2416_s20 + $0xc4] sm:$0x1] %v1199_v2 }
 0x1d1   : > { %1202 = vst [vmem:[%s2416_s20 + $0xc6] sm:$0x1] %v1201_v3 }
 0x1d2   : > { %1204 = vst [vmem:[%s2416_s20 + $0xc8] sm:$0x1] %v1203_v4 }
 0x1d3   : > { %1206 = vst [vmem:[%s2416_s20 + $0xca] sm:$0x1] %v1205_v0 }
 0x1d4   : > { %1208 = vst [vmem:[%s2416_s20 + $0xcc] sm:$0x1] %v1207_v6 }
 0x1d5   : > { %1210 = vst [vmem:[%s2416_s20 + $0xce] sm:$0x1] %v1209_v7 }
 0x1d6   : > { %1212 = vst [vmem:[%s2416_s20 + $0xd0] sm:$0x1] %v1211_v39 }
 0x1d7   : > { %1214 = vst [vmem:[%s2416_s20 + $0xd2] sm:$0x1] %v1213_v40 }
 0x1d8   : > { %1216 = vst [vmem:[%s2416_s20 + $0xd4] sm:$0x1] %v1215_v12 }
 0x1d9   : > { %1218 = vst [vmem:[%s2416_s20 + $0xd6] sm:$0x1] %v1217_v13 }
 0x1da   : > { %1220 = vst [vmem:[%s2416_s20 + $0xd8] sm:$0x1] %v1219_v18 }
 0x1db   : > { %1222 = vst [vmem:[%s2416_s20 + $0xda] sm:$0x1] %v1221_v5 }
 0x1dc   : > { %1224 = vst [vmem:[%s2416_s20 + $0xdc] sm:$0x1] %v1223_v23 }
 0x1dd   : > { %1226 = vst [vmem:[%s2416_s20 + $0xde] sm:$0x1] %v1225_v16 }
 0x1de   : > { %1228 = vst [vmem:[%s2416_s20 + $0xe0] sm:$0x1] %v1227_v15 }
 0x1df   : > { %1230 = vst [vmem:[%s2416_s20 + $0xe2] sm:$0x1] %v1229_v19 }
 0x1e0   : > { %1232 = vst [vmem:[%s2416_s20 + $0xe4] sm:$0x1] %v1231_v11 }
 0x1e1   : > { %1234 = vst [vmem:[%s2416_s20 + $0xe6] sm:$0x1] %v1233_v27 }
 0x1e2   : > { %1236 = vst [vmem:[%s2416_s20 + $0xe8] sm:$0x1] %v1235_v22 }
 0x1e3   : > { %1238 = vst [vmem:[%s2416_s20 + $0xea] sm:$0x1] %v1237_v8 }
 0x1e4   : > { %1240 = vst [vmem:[%s2416_s20 + $0xec] sm:$0x1] %v1239_v28 }
 0x1e5   : > { %1242 = vst [vmem:[%s2416_s20 + $0xee] sm:$0x1] %v1241_v25 }
 0x1e6   : > { %1244 = vst [vmem:[%s2416_s20 + $0xf0] sm:$0x1] %v1243_v31 }
 0x1e7   : > { %1246 = vst [vmem:[%s2416_s20 + $0xf2] sm:$0x1] %v1245_v26 }
 0x1e8   : > { %1248 = vst [vmem:[%s2416_s20 + $0xf4] sm:$0x1] %v1247_v17 }
 0x1e9   : > { %1250 = vst [vmem:[%s2416_s20 + $0xf6] sm:$0x1] %v1249_v32 }
 0x1ea   : > { %1252 = vst [vmem:[%s2416_s20 + $0xf8] sm:$0x1] %v1251_v14 }
 0x1eb   : > { %1254 = vst [vmem:[%s2416_s20 + $0xfa] sm:$0x1] %v1253_v33 }
 0x1ec   : > { %1256 = vst [vmem:[%s2416_s20 + $0xfc] sm:$0x1] %v1255_v34 }
 0x1ed   : > { %1258 = vst [vmem:[%s2416_s20 + $0xfe] sm:$0x1] %v1257_v35 }
 0x1ee PF: > { %s1689_s23 = sshll.u32 %s1835_s12, 4  ;;  %s1547_s24 = sshll.u32 %s2096_s6, 4  ;;  %s1548_s24 = int_to_ptr.vmem [resolvable:$true] %s1547_s24 }
 0x1ef   : > { %s1546_s27 = scalar_lea.hbm %s2716_s2, %s1689_s23  ;;  %s1785_s7 = scalar_lea.hbm %s2716_s2, 32 }
 0x1f0   : > { %s1549_s28 = sshll.u32 %s1546_s27, 4  ;;  %s1550_s28 = int_to_ptr.hbm [resolvable:$true] %s1549_s28 }
 0x1f1   : > { %s1779_s29 = sshra.s32 %s1550_s28, 4  ;;  %s1780_s29 = int_to_ptr.hbm [resolvable:$true] %s1779_s29 }
 0x1f2   : > { %s1781_s3 = scalar_lea.hbm %s1780_s29, 16  ;;  %p1786_p3 = scmp.lt.s32.totalorder %s1780_s29, %s2716_s2 }
 0x1f3   : > { %p1782_p0 = scmp.ne.s32.totalorder %s1780_s29, %s1781_s3  ;;  %p1787_p4 = scmp.lt.s32.totalorder %s1785_s7, %s1781_s3 }
 0x1f5   : > { %p1783_p1 = pnand %p1782_p0, %p1903_p5  ;;  %p1788_p6 = por %p1787_p4, %p1786_p3 }
 0x1f7   : > { %p1784_p2 = pneg %p1783_p1 }
 0x1f9   : > { %p1789_p7 = pnand %p1788_p6, %p1784_p2 }
 0x1fb   : > { %1792 = shalt.err (!%p1789_p7)
}
 0x1fc   : > { %s1847_s8 = smov 128   ;;  %s1848_s16 = smov 8  }
 0x1fd   : > { %1690 = dma.vmem_to_hbm [thread:$0]  (%p1903_p5), %s1548_s24, 256, %s1550_s28, %s975_s15, %s1847_s8, %s1847_s8, %s1848_s16  }
 0x1fe PF: > { %s1571_s18 = sand.u32 1, %s1823_s9   ;;  %p1693_p8 = pnand %p1670_p10, %p1914_p9 }
 0x1ff   : > { %s1572_s20 = scalar_lea.sflag [#allocation5], %s1571_s18 }
 0x200   : > { %p1694_p11 = pneg %p1693_p8 }
 0x202   : > { %1818 = dma.done.wait (%p1694_p11), %s1572_s20, 256  }
 0x203   : > { %1820 = vsyncadd (%p1694_p11), %s1572_s20, 4294967040  ;;  %s16_s14 = sadd.s32 1, %s1843_s14   ;;  %s2731_s9 = smov %s1827_s10 }
 0x204   : > { %p13_p12 = scmp.ge.s32.totalorder %s16_s14, 4   ;;  %s2732_s10 = smov %s1831_s11 }
 0x205   : > { %s2733_s11 = smov %s1912_s21  ;;  %s2734_s12 = smov %s1839_s13 }
 0x206   : > { %s2735_s13 = smov %s2737_s17  ;;  %15 = sbr.rel (!%p13_p12) target bundleno = 4 (0x4), region = 156 }
 0x20b   :  { %1578 = vsyncpa [#allocation5], 1 }
 0x20c   :  { %1580 = vsyncpa [#allocation5 + $0x1], 1 }

</bundles_post_ra>
